<compile_context>
chip_gen: v7x
topology: tpu7x:2x2x1
jax: 0.10.0
libtpu: 0.0.40
codegen_flags: <defaults>
</compile_context>

<pallas_src>
import functools
import math

import jax
import jax.numpy as jnp
from jax import lax
from jax.experimental import pallas as pl
from jax.experimental.pallas import tpu as pltpu

# ---------------- synthetic "BERT" config (small) ----------------
VOCAB_SIZE   = 50
MAX_POS      = 16
HIDDEN       = 128      # lane-aligned
NUM_LAYERS   = 2
NUM_HEADS    = 4
HEAD_DIM     = HIDDEN // NUM_HEADS
INTERMEDIATE = 256
NUM_CLASSES  = 4
LOGITS_PAD   = 128      # lane-dense padded logits width
BATCH        = 2
SEQ          = 8
LN_EPS_BERT  = 1e-12
LN_EPS_HEAD  = 1e-5     # nn.LayerNorm default

# rows of the packed per-layer vector array (L, 9, H)
_BQ, _BK, _BV, _BO, _G1, _BE1, _B2, _G2, _BE2 = range(9)
# rows of the packed head vector array (4, 128)
_BP, _GH, _BH, _BFC = range(4)


# ---------------- small in-kernel helpers ----------------
def _layer_norm(x, gamma, beta, eps):
    # independent reductions: E[x] and E[x^2] (no serial mu -> (x-mu)^2 chain)
    mu = jnp.mean(x, axis=-1, keepdims=True)
    ms = jnp.mean(x * x, axis=-1, keepdims=True)
    var = ms - mu * mu
    return (x - mu) * lax.rsqrt(var + eps) * gamma + beta


def _softmax_last(x):
    m = jnp.max(x, axis=-1, keepdims=True)
    e = jnp.exp(x - m)
    # divide goes to the EUP slot instead of VALU
    return e * pl.reciprocal(jnp.sum(e, axis=-1, keepdims=True), approx=True)


def _gelu(x):
    # TODO(synk): HF BERT default is exact erf-GELU; tanh approx used here
    # (irrelevant for synthetic weights).
    c = math.sqrt(2.0 / math.pi)
    return 0.5 * x * (1.0 + jnp.tanh(c * (x + 0.044715 * x * x * x)))


def _rowdot(a, b):
    # a @ b with f32 accumulation on the MXU
    return jnp.dot(a, b, preferred_element_type=jnp.float32)


def _dot_rhs_t(a, b):
    # a @ b.T without an explicit transpose (contract last dims of both)
    return lax.dot_general(a, b, (((1,), (1,)), ((), ())),
                           preferred_element_type=jnp.float32)


# ---------------- single fused kernel: 2 encoder layers + head ----------------
def fused_bert_kernel(nb, x_ref, bias_ref,
                      w_qkv, w_o, w1, w2, b1, vecs, w_head, v_head,
                      out_ref):
    # per grid step: `nb` batch elements stacked along the sublane axis.
    S, H, dh = SEQ, HIDDEN, HEAD_DIM
    x = x_ref[...]                              # (nb*S, H)

    # ---- transformer encoder layers (statically unrolled) ----
    for l in range(NUM_LAYERS):
        vec_l = vecs[l]                          # (9, H)

        # fused lane-dense QKV projection: one (nb*S,128)x(128,384) matmul
        qkv = _rowdot(x, w_qkv[l])               # (nb*S, 3H)
        q_all = qkv[:, 0:H]       + vec_l[_BQ:_BQ + 1, :]   # wq/bq pre-scaled
        k_all = qkv[:, H:2 * H]   + vec_l[_BK:_BK + 1, :]
        v_all = qkv[:, 2 * H:3 * H] + vec_l[_BV:_BV + 1, :]

        # scores for every (batch, head) pair, stacked on sublanes -> one softmax
        score_tiles = []
        for b in range(nb):
            r0 = b * S
            bias_b = bias_ref[b:b + 1, :]        # (1, S): (1-mask)*-10000
            for h in range(NUM_HEADS):
                c0 = h * dh
                qh = q_all[r0:r0 + S, c0:c0 + dh]          # (S, dh)
                kh = k_all[r0:r0 + S, c0:c0 + dh]          # (S, dh)
                score_tiles.append(_dot_rhs_t(qh, kh) + bias_b)   # (S, S)
        attn_all = _softmax_last(jnp.concatenate(score_tiles, axis=0))  # (nb*NH*S, S)

        # context per (batch, head); lane-concat heads -> (S, H) per batch
        ctx_rows = []
        for b in range(nb):
            r0 = b * S
            ctx_heads = []
            for h in range(NUM_HEADS):
                idx = (b * NUM_HEADS + h) * S
                attn_bh = attn_all[idx:idx + S, :]                 # (S, S)
                vh = v_all[r0:r0 + S, h * dh:(h + 1) * dh]         # (S, dh)
                ctx_heads.append(_rowdot(attn_bh, vh))             # (S, dh)
            ctx_rows.append(jnp.concatenate(ctx_heads, axis=1))    # (S, H)
        ctx_all = ctx_rows[0] if nb == 1 else jnp.concatenate(ctx_rows, axis=0)

        # fused output projection: one (nb*S,128)x(128,128) matmul
        attn_out = _rowdot(ctx_all, w_o[l]) + vec_l[_BO:_BO + 1, :]

        h1 = _layer_norm(x + attn_out,
                         vec_l[_G1:_G1 + 1, :], vec_l[_BE1:_BE1 + 1, :], LN_EPS_BERT)
        ff = _gelu(_rowdot(h1, w1[l]) + b1[l])                      # (nb*S, I)
        x = _layer_norm(h1 + _rowdot(ff, w2[l]) + vec_l[_B2:_B2 + 1, :],
                        vec_l[_G2:_G2 + 1, :], vec_l[_BE2:_BE2 + 1, :], LN_EPS_BERT)

    # ---- pooler + attention-pooling classification head (per batch element) ----
    wp  = w_head[0]                              # (H, H)
    wfc = w_head[1]                              # (H, 128) zero-padded past NUM_CLASSES
    vh_all = v_head[...]                         # (4, 128)
    bp  = vh_all[_BP:_BP + 1, :]
    gh  = vh_all[_GH:_GH + 1, :]
    bh  = vh_all[_BH:_BH + 1, :]
    bfc = vh_all[_BFC:_BFC + 1, :]

    for b in range(nb):
        r0 = b * S
        xb = x[r0:r0 + S, :]                                 # (S, H)
        pooled = jnp.tanh(_rowdot(xb[0:1, :], wp) + bp)      # (1, H)

        scores = _dot_rhs_t(pooled, xb)                      # (1, S)
        bias_b = bias_ref[b:b + 1, :]
        # masked_fill(mask == 0, -1e9): mask==0 exactly where the bias is negative
        scores = jnp.where(bias_b < 0.0, -1.0e9, scores)
        attn = _softmax_last(scores)                         # (1, S)

        ctx = _rowdot(attn, xb)                              # (1, H)
        combined = _layer_norm(pooled + ctx, gh, bh, LN_EPS_HEAD)
        # dropout(0.3): identity in eval mode
        out_ref[b:b + 1, :] = _rowdot(combined, wfc) + bfc   # (1, 128) lane-dense


# ---------------- pallas_call wrapper ----------------
def _full_spec(arr):
    nd = arr.ndim
    return pl.BlockSpec(arr.shape, lambda g, _nd=nd: (0,) * _nd)


def _batch_per_step(batch):
    """How many batch elements to stack per grid step.

    Single-TensorCore chips (v5e / v6e): stack the whole batch into one
    (B*S, H) tile.  Multi-core chips (v7x, megacore): keep one element per
    grid step so the parallel grid axis can be split across cores.
    """
    try:
        kind = jax.devices()[0].device_kind.lower()
    except Exception:
        return 1
    single_tc = any(t in kind for t in
                    ("v5 lite", "v5e", "v5litepod", "v6 lite", "v6e", "trillium"))
    return batch if single_tc else 1


def run_fused_model(x, mask_bias, params):
    B, S, H = x.shape
    nb = _batch_per_step(B)
    if B % nb != 0:
        nb = 1
    G = B // nb

    x_stacked = x.reshape(G, nb * S, H)
    bias_stacked = mask_bias.reshape(G, nb, S)

    weights = (params["w_qkv"], params["w_o"], params["w1"], params["w2"],
               params["b1"], params["vecs"], params["w_head"], params["v_head"])

    in_specs = ([pl.BlockSpec((None, nb * S, H), lambda g: (g, 0, 0)),
                 pl.BlockSpec((None, nb, S), lambda g: (g, 0, 0))]
                + [_full_spec(w) for w in weights])

    out = pl.pallas_call(
        functools.partial(fused_bert_kernel, nb),
        out_shape=jax.ShapeDtypeStruct((G, nb, LOGITS_PAD), jnp.float32),
        grid=(G,),
        in_specs=in_specs,
        out_specs=pl.BlockSpec((None, nb, LOGITS_PAD), lambda g: (g, 0, 0)),
        compiler_params=pltpu.CompilerParams(
            # one batch element per TensorCore on multi-core chips; harmless
            # (size-1 grid) when the batch is stacked on single-TC chips.
            dimension_semantics=("parallel",)),
    )(x_stacked, bias_stacked, *weights)
    # total weights ~1.2 MiB f32 + tiny activations: well under the VMEM limit
    # on every generation, so full-resident weights / no extra tiling.
    return out.reshape(B, LOGITS_PAD)[:, :NUM_CLASSES]


# ---------------- parameter construction (deterministic) ----------------
def make_params(key):
    def nrm(k, shape, std=0.02):
        return (std * jax.random.normal(k, shape)).astype(jnp.float32)

    L, NH, H, dh, I = NUM_LAYERS, NUM_HEADS, HIDDEN, HEAD_DIM, INTERMEDIATE
    keys = iter(jax.random.split(key, 64))

    params = {
        "tok_emb":  nrm(next(keys), (VOCAB_SIZE, H)),
        "pos_emb":  nrm(next(keys), (MAX_POS, H)),
        "type_emb": nrm(next(keys), (2, H)),
        "emb_g":    jnp.ones((H,), jnp.float32),
        "emb_b":    jnp.zeros((H,), jnp.float32),
    }

    # fused lane-dense attention weights; Q pre-scaled by 1/sqrt(head_dim)
    scale = 1.0 / math.sqrt(dh)
    wq = nrm(next(keys), (L, H, H)) * scale
    wk = nrm(next(keys), (L, H, H))
    wv = nrm(next(keys), (L, H, H))
    params["w_qkv"] = jnp.concatenate([wq, wk, wv], axis=2)        # (L, H, 3H)
    params["w_o"]   = nrm(next(keys), (L, H, H))                   # (L, H, H)

    params["w1"] = nrm(next(keys), (L, H, I))                      # (L, H, I)
    params["w2"] = nrm(next(keys), (L, I, H))                      # (L, I, H)
    params["b1"] = jnp.zeros((L, 1, I), jnp.float32)

    # packed per-layer vectors (L, 9, H): [bq*scale, bk, bv, bo, g1, be1, b2, g2, be2]
    zeros = jnp.zeros((L, 1, H), jnp.float32)
    ones = jnp.ones((L, 1, H), jnp.float32)
    params["vecs"] = jnp.concatenate(
        [zeros * scale, zeros, zeros, zeros,   # bq (pre-scaled), bk, bv, bo
         ones, zeros,                          # g1, be1
         zeros, ones, zeros], axis=1)          # b2, g2, be2

    # head: pooler + final Linear (padded to lane-dense 128 cols), packed
    wp = nrm(next(keys), (H, H))
    wfc = nrm(next(keys), (H, NUM_CLASSES))
    wfc_pad = jnp.zeros((H, LOGITS_PAD), jnp.float32).at[:, :NUM_CLASSES].set(wfc)
    params["w_head"] = jnp.stack([wp, wfc_pad], axis=0)            # (2, H, 128)
    # packed head vectors (4, 128): [bp, gamma, beta, bfc]
    params["v_head"] = jnp.concatenate(
        [jnp.zeros((1, H)), jnp.ones((1, H)),
         jnp.zeros((1, H)), jnp.zeros((1, LOGITS_PAD))], axis=0).astype(jnp.float32)
    return params


# ---------------- full forward (glue in JAX, compute in one Pallas call) ----
@jax.jit
def model_forward(context, mask, params):
    B, S = context.shape
    # embeddings (gather glue) + embedding LayerNorm
    pos_ids = jnp.arange(S)
    x = (params["tok_emb"][context]
         + params["pos_emb"][pos_ids][None, :, :]
         + params["type_emb"][0][None, None, :])
    mu = jnp.mean(x, axis=-1, keepdims=True)
    var = jnp.mean((x - mu) ** 2, axis=-1, keepdims=True)
    x = (x - mu) * lax.rsqrt(var + LN_EPS_BERT) * params["emb_g"] + params["emb_b"]
    x = x.astype(jnp.float32)

    # HF-style additive attention bias, precomputed once, shape (B, S)
    mask_bias = (1.0 - mask.astype(jnp.float32)) * -10000.0

    # 2 encoder layers + pooler + attention-pooling head, fully fused
    logits = run_fused_model(x, mask_bias, params)
    probabilities = jax.nn.softmax(logits, axis=1)  # stored attr in torch code
    return logits, probabilities


if __name__ == "__main__":
    key = jax.random.PRNGKey(0)
    kp, kc = jax.random.split(key)
    params = make_params(kp)

    context = jax.random.randint(kc, (BATCH, SEQ), 1, VOCAB_SIZE, dtype=jnp.int32)
    mask = jnp.array([[1, 1, 1, 1, 1, 1, 1, 1],
                      [1, 1, 1, 1, 1, 1, 0, 0]], dtype=jnp.int32)

    logits, probs = model_forward(context, mask, params)
    jax.block_until_ready(logits)
    jax.block_until_ready(probs)

    assert logits.shape == (BATCH, NUM_CLASSES)
    assert probs.shape == (BATCH, NUM_CLASSES)
    assert bool(jnp.all(jnp.isfinite(logits)))
    print("KERNEL_OK")
</pallas_src>

<mosaic_0001>
module attributes {stable_mosaic.version = 11 : i64} {
  func.func @fused_bert_kernel(%arg0: i32, %arg1: memref<1x8x128xf32, #tpu.memory_space<vmem>>, %arg2: memref<1x1x8xf32, #tpu.memory_space<vmem>>, %arg3: memref<2x128x384xf32, #tpu.memory_space<vmem>>, %arg4: memref<2x128x128xf32, #tpu.memory_space<vmem>>, %arg5: memref<2x128x256xf32, #tpu.memory_space<vmem>>, %arg6: memref<2x256x128xf32, #tpu.memory_space<vmem>>, %arg7: memref<2x1x256xf32, #tpu.memory_space<vmem>>, %arg8: memref<2x9x128xf32, #tpu.memory_space<vmem>>, %arg9: memref<2x128x128xf32, #tpu.memory_space<vmem>>, %arg10: memref<4x128xf32, #tpu.memory_space<vmem>>, %arg11: memref<1x1x128xf32, #tpu.memory_space<vmem>>) attributes {dimension_semantics = [#tpu.dimension_semantics<parallel>], iteration_bounds = array<i64: 2>, scalar_prefetch = 0 : i64, scratch_operands = 0 : i64, tpu.core_type = #tpu.core_type<tc>, window_params = [{transform_indices = @transform_0, window_bounds = array<i64: 1, 8, 128>}, {transform_indices = @transform_1, window_bounds = array<i64: 1, 1, 8>}, {pipeline_mode = #tpu.pipeline_mode<synchronous>, transform_indices = @transform_2, window_bounds = array<i64: 2, 128, 384>}, {pipeline_mode = #tpu.pipeline_mode<synchronous>, transform_indices = @transform_3, window_bounds = array<i64: 2, 128, 128>}, {pipeline_mode = #tpu.pipeline_mode<synchronous>, transform_indices = @transform_4, window_bounds = array<i64: 2, 128, 256>}, {pipeline_mode = #tpu.pipeline_mode<synchronous>, transform_indices = @transform_5, window_bounds = array<i64: 2, 256, 128>}, {pipeline_mode = #tpu.pipeline_mode<synchronous>, transform_indices = @transform_6, window_bounds = array<i64: 2, 1, 256>}, {pipeline_mode = #tpu.pipeline_mode<synchronous>, transform_indices = @transform_7, window_bounds = array<i64: 2, 9, 128>}, {pipeline_mode = #tpu.pipeline_mode<synchronous>, transform_indices = @transform_8, window_bounds = array<i64: 2, 128, 128>}, {pipeline_mode = #tpu.pipeline_mode<synchronous>, transform_indices = @transform_9, window_bounds = array<i64: 4, 128>}, {transform_indices = @transform_10, window_bounds = array<i64: 1, 1, 128>}]} {
    %c0 = arith.constant 0 : index
    %c0_0 = arith.constant 0 : index
    %c0_1 = arith.constant 0 : index
    %0 = vector.load %arg1[%c0, %c0_0, %c0_1] : memref<1x8x128xf32, #tpu.memory_space<vmem>>, vector<1x8x128xf32>
    %1 = vector.shape_cast %0 : vector<1x8x128xf32> to vector<8x128xf32>
    %c0_2 = arith.constant 0 : index
    %c0_3 = arith.constant 0 : index
    %c0_4 = arith.constant 0 : index
    %2 = vector.load %arg8[%c0_2, %c0_3, %c0_4] : memref<2x9x128xf32, #tpu.memory_space<vmem>>, vector<1x9x128xf32>
    %3 = vector.shape_cast %2 : vector<1x9x128xf32> to vector<9x128xf32>
    %c0_5 = arith.constant 0 : index
    %c0_6 = arith.constant 0 : index
    %c0_7 = arith.constant 0 : index
    %4 = vector.load %arg3[%c0_5, %c0_6, %c0_7] : memref<2x128x384xf32, #tpu.memory_space<vmem>>, vector<1x128x384xf32>
    %5 = vector.shape_cast %4 : vector<1x128x384xf32> to vector<128x384xf32>
    %cst = arith.constant dense<0.000000e+00> : vector<8x384xf32>
    %6 = tpu.matmul %1, %5, %cst {dimension_numbers = #tpu.dot_dimension_numbers<[1], [0], [0], [1], [0, 0, 1, 1], [], []>} : vector<8x128xf32>, vector<128x384xf32>, vector<8x384xf32> -> vector<8x384xf32>
    %7 = vector.extract_strided_slice %6 {offsets = [0, 0], sizes = [8, 128], strides = [1, 1]} : vector<8x384xf32> to vector<8x128xf32>
    %8 = vector.extract_strided_slice %3 {offsets = [0, 0], sizes = [1, 128], strides = [1, 1]} : vector<9x128xf32> to vector<1x128xf32>
    %9 = vector.broadcast %8 : vector<1x128xf32> to vector<8x128xf32>
    %10 = arith.addf %7, %9 : vector<8x128xf32>
    %11 = vector.extract_strided_slice %6 {offsets = [0, 128], sizes = [8, 128], strides = [1, 1]} : vector<8x384xf32> to vector<8x128xf32>
    %12 = vector.extract_strided_slice %3 {offsets = [1, 0], sizes = [1, 128], strides = [1, 1]} : vector<9x128xf32> to vector<1x128xf32>
    %13 = vector.broadcast %12 : vector<1x128xf32> to vector<8x128xf32>
    %14 = arith.addf %11, %13 : vector<8x128xf32>
    %15 = vector.extract_strided_slice %6 {offsets = [0, 256], sizes = [8, 128], strides = [1, 1]} : vector<8x384xf32> to vector<8x128xf32>
    %16 = vector.extract_strided_slice %3 {offsets = [2, 0], sizes = [1, 128], strides = [1, 1]} : vector<9x128xf32> to vector<1x128xf32>
    %17 = vector.broadcast %16 : vector<1x128xf32> to vector<8x128xf32>
    %18 = arith.addf %15, %17 : vector<8x128xf32>
    %c0_8 = arith.constant 0 : index
    %c0_9 = arith.constant 0 : index
    %c0_10 = arith.constant 0 : index
    %19 = vector.load %arg2[%c0_8, %c0_9, %c0_10] : memref<1x1x8xf32, #tpu.memory_space<vmem>>, vector<1x1x8xf32>
    %20 = vector.shape_cast %19 : vector<1x1x8xf32> to vector<1x8xf32>
    %21 = vector.extract_strided_slice %10 {offsets = [0, 0], sizes = [8, 32], strides = [1, 1]} : vector<8x128xf32> to vector<8x32xf32>
    %22 = vector.extract_strided_slice %14 {offsets = [0, 0], sizes = [8, 32], strides = [1, 1]} : vector<8x128xf32> to vector<8x32xf32>
    %cst_11 = arith.constant dense<0.000000e+00> : vector<8x8xf32>
    %23 = tpu.matmul %21, %22, %cst_11 {dimension_numbers = #tpu.dot_dimension_numbers<[1], [1], [0], [0], [0, 0, 1, 0], [], []>} : vector<8x32xf32>, vector<8x32xf32>, vector<8x8xf32> -> vector<8x8xf32>
    %24 = vector.broadcast %20 : vector<1x8xf32> to vector<8x8xf32>
    %25 = arith.addf %23, %24 : vector<8x8xf32>
    %26 = vector.extract_strided_slice %10 {offsets = [0, 32], sizes = [8, 32], strides = [1, 1]} : vector<8x128xf32> to vector<8x32xf32>
    %27 = vector.extract_strided_slice %14 {offsets = [0, 32], sizes = [8, 32], strides = [1, 1]} : vector<8x128xf32> to vector<8x32xf32>
    %cst_12 = arith.constant dense<0.000000e+00> : vector<8x8xf32>
    %28 = tpu.matmul %26, %27, %cst_12 {dimension_numbers = #tpu.dot_dimension_numbers<[1], [1], [0], [0], [0, 0, 1, 0], [], []>} : vector<8x32xf32>, vector<8x32xf32>, vector<8x8xf32> -> vector<8x8xf32>
    %29 = vector.broadcast %20 : vector<1x8xf32> to vector<8x8xf32>
    %30 = arith.addf %28, %29 : vector<8x8xf32>
    %31 = vector.extract_strided_slice %10 {offsets = [0, 64], sizes = [8, 32], strides = [1, 1]} : vector<8x128xf32> to vector<8x32xf32>
    %32 = vector.extract_strided_slice %14 {offsets = [0, 64], sizes = [8, 32], strides = [1, 1]} : vector<8x128xf32> to vector<8x32xf32>
    %cst_13 = arith.constant dense<0.000000e+00> : vector<8x8xf32>
    %33 = tpu.matmul %31, %32, %cst_13 {dimension_numbers = #tpu.dot_dimension_numbers<[1], [1], [0], [0], [0, 0, 1, 0], [], []>} : vector<8x32xf32>, vector<8x32xf32>, vector<8x8xf32> -> vector<8x8xf32>
    %34 = vector.broadcast %20 : vector<1x8xf32> to vector<8x8xf32>
    %35 = arith.addf %33, %34 : vector<8x8xf32>
    %36 = vector.extract_strided_slice %10 {offsets = [0, 96], sizes = [8, 32], strides = [1, 1]} : vector<8x128xf32> to vector<8x32xf32>
    %37 = vector.extract_strided_slice %14 {offsets = [0, 96], sizes = [8, 32], strides = [1, 1]} : vector<8x128xf32> to vector<8x32xf32>
    %cst_14 = arith.constant dense<0.000000e+00> : vector<8x8xf32>
    %38 = tpu.matmul %36, %37, %cst_14 {dimension_numbers = #tpu.dot_dimension_numbers<[1], [1], [0], [0], [0, 0, 1, 0], [], []>} : vector<8x32xf32>, vector<8x32xf32>, vector<8x8xf32> -> vector<8x8xf32>
    %39 = vector.broadcast %20 : vector<1x8xf32> to vector<8x8xf32>
    %40 = arith.addf %38, %39 : vector<8x8xf32>
    %41 = tpu.concatenate %25, %30, %35, %40 in 0 : vector<8x8xf32>, vector<8x8xf32>, vector<8x8xf32>, vector<8x8xf32> -> vector<32x8xf32>
    %cst_15 = arith.constant dense<0xFF800000> : vector<32xf32>
    %42 = vector.multi_reduction <maximumf>, %41, %cst_15 [1] : vector<32x8xf32> to vector<32xf32>
    %43 = vector.shape_cast %42 : vector<32xf32> to vector<32x1xf32>
    %44 = vector.broadcast %43 : vector<32x1xf32> to vector<32x8xf32>
    %45 = arith.subf %41, %44 : vector<32x8xf32>
    %46 = math.exp %45 : vector<32x8xf32>
    %cst_16 = arith.constant dense<0.000000e+00> : vector<32xf32>
    %47 = vector.multi_reduction <add>, %46, %cst_16 [1] : vector<32x8xf32> to vector<32xf32>
    %48 = vector.shape_cast %47 : vector<32xf32> to vector<32x1xf32>
    %49 = tpu.reciprocal %48 {approx = true} : vector<32x1xf32> -> vector<32x1xf32>
    %50 = vector.broadcast %49 : vector<32x1xf32> to vector<32x8xf32>
    %51 = arith.mulf %46, %50 : vector<32x8xf32>
    %52 = vector.extract_strided_slice %51 {offsets = [0, 0], sizes = [8, 8], strides = [1, 1]} : vector<32x8xf32> to vector<8x8xf32>
    %53 = vector.extract_strided_slice %18 {offsets = [0, 0], sizes = [8, 32], strides = [1, 1]} : vector<8x128xf32> to vector<8x32xf32>
    %cst_17 = arith.constant dense<0.000000e+00> : vector<8x32xf32>
    %54 = tpu.matmul %52, %53, %cst_17 {dimension_numbers = #tpu.dot_dimension_numbers<[1], [0], [0], [1], [0, 0, 1, 1], [], []>} : vector<8x8xf32>, vector<8x32xf32>, vector<8x32xf32> -> vector<8x32xf32>
    %55 = vector.extract_strided_slice %51 {offsets = [8, 0], sizes = [8, 8], strides = [1, 1]} : vector<32x8xf32> to vector<8x8xf32>
    %56 = vector.extract_strided_slice %18 {offsets = [0, 32], sizes = [8, 32], strides = [1, 1]} : vector<8x128xf32> to vector<8x32xf32>
    %cst_18 = arith.constant dense<0.000000e+00> : vector<8x32xf32>
    %57 = tpu.matmul %55, %56, %cst_18 {dimension_numbers = #tpu.dot_dimension_numbers<[1], [0], [0], [1], [0, 0, 1, 1], [], []>} : vector<8x8xf32>, vector<8x32xf32>, vector<8x32xf32> -> vector<8x32xf32>
    %58 = vector.extract_strided_slice %51 {offsets = [16, 0], sizes = [8, 8], strides = [1, 1]} : vector<32x8xf32> to vector<8x8xf32>
    %59 = vector.extract_strided_slice %18 {offsets = [0, 64], sizes = [8, 32], strides = [1, 1]} : vector<8x128xf32> to vector<8x32xf32>
    %cst_19 = arith.constant dense<0.000000e+00> : vector<8x32xf32>
    %60 = tpu.matmul %58, %59, %cst_19 {dimension_numbers = #tpu.dot_dimension_numbers<[1], [0], [0], [1], [0, 0, 1, 1], [], []>} : vector<8x8xf32>, vector<8x32xf32>, vector<8x32xf32> -> vector<8x32xf32>
    %61 = vector.extract_strided_slice %51 {offsets = [24, 0], sizes = [8, 8], strides = [1, 1]} : vector<32x8xf32> to vector<8x8xf32>
    %62 = vector.extract_strided_slice %18 {offsets = [0, 96], sizes = [8, 32], strides = [1, 1]} : vector<8x128xf32> to vector<8x32xf32>
    %cst_20 = arith.constant dense<0.000000e+00> : vector<8x32xf32>
    %63 = tpu.matmul %61, %62, %cst_20 {dimension_numbers = #tpu.dot_dimension_numbers<[1], [0], [0], [1], [0, 0, 1, 1], [], []>} : vector<8x8xf32>, vector<8x32xf32>, vector<8x32xf32> -> vector<8x32xf32>
    %64 = tpu.concatenate %54, %57, %60, %63 in 1 : vector<8x32xf32>, vector<8x32xf32>, vector<8x32xf32>, vector<8x32xf32> -> vector<8x128xf32>
    %c0_21 = arith.constant 0 : index
    %c0_22 = arith.constant 0 : index
    %c0_23 = arith.constant 0 : index
    %65 = vector.load %arg4[%c0_21, %c0_22, %c0_23] : memref<2x128x128xf32, #tpu.memory_space<vmem>>, vector<1x128x128xf32>
    %66 = vector.shape_cast %65 : vector<1x128x128xf32> to vector<128x128xf32>
    %cst_24 = arith.constant dense<0.000000e+00> : vector<8x128xf32>
    %67 = tpu.matmul %64, %66, %cst_24 {dimension_numbers = #tpu.dot_dimension_numbers<[1], [0], [0], [1], [0, 0, 1, 1], [], []>} : vector<8x128xf32>, vector<128x128xf32>, vector<8x128xf32> -> vector<8x128xf32>
    %68 = vector.extract_strided_slice %3 {offsets = [3, 0], sizes = [1, 128], strides = [1, 1]} : vector<9x128xf32> to vector<1x128xf32>
    %69 = vector.broadcast %68 : vector<1x128xf32> to vector<8x128xf32>
    %70 = arith.addf %67, %69 : vector<8x128xf32>
    %71 = arith.addf %1, %70 : vector<8x128xf32>
    %72 = vector.extract_strided_slice %3 {offsets = [4, 0], sizes = [1, 128], strides = [1, 1]} : vector<9x128xf32> to vector<1x128xf32>
    %73 = vector.extract_strided_slice %3 {offsets = [5, 0], sizes = [1, 128], strides = [1, 1]} : vector<9x128xf32> to vector<1x128xf32>
    %cst_25 = arith.constant dense<0.000000e+00> : vector<8xf32>
    %74 = vector.multi_reduction <add>, %71, %cst_25 [1] : vector<8x128xf32> to vector<8xf32>
    %75 = vector.shape_cast %74 : vector<8xf32> to vector<8x1xf32>
    %cst_26 = arith.constant 1.280000e+02 : f32
    %76 = vector.broadcast %cst_26 : f32 to vector<8x1xf32>
    %77 = arith.divf %75, %76 : vector<8x1xf32>
    %78 = arith.mulf %71, %71 : vector<8x128xf32>
    %cst_27 = arith.constant dense<0.000000e+00> : vector<8xf32>
    %79 = vector.multi_reduction <add>, %78, %cst_27 [1] : vector<8x128xf32> to vector<8xf32>
    %80 = vector.shape_cast %79 : vector<8xf32> to vector<8x1xf32>
    %cst_28 = arith.constant 1.280000e+02 : f32
    %81 = vector.broadcast %cst_28 : f32 to vector<8x1xf32>
    %82 = arith.divf %80, %81 : vector<8x1xf32>
    %83 = arith.mulf %77, %77 : vector<8x1xf32>
    %84 = arith.subf %82, %83 : vector<8x1xf32>
    %85 = vector.broadcast %77 : vector<8x1xf32> to vector<8x128xf32>
    %86 = arith.subf %71, %85 : vector<8x128xf32>
    %cst_29 = arith.constant 9.99999996E-13 : f32
    %87 = vector.broadcast %cst_29 : f32 to vector<8x1xf32>
    %88 = arith.addf %84, %87 : vector<8x1xf32>
    %89 = math.rsqrt %88 : vector<8x1xf32>
    %90 = vector.broadcast %89 : vector<8x1xf32> to vector<8x128xf32>
    %91 = arith.mulf %86, %90 : vector<8x128xf32>
    %92 = vector.broadcast %72 : vector<1x128xf32> to vector<8x128xf32>
    %93 = arith.mulf %91, %92 : vector<8x128xf32>
    %94 = vector.broadcast %73 : vector<1x128xf32> to vector<8x128xf32>
    %95 = arith.addf %93, %94 : vector<8x128xf32>
    %c0_30 = arith.constant 0 : index
    %c0_31 = arith.constant 0 : index
    %c0_32 = arith.constant 0 : index
    %96 = vector.load %arg5[%c0_30, %c0_31, %c0_32] : memref<2x128x256xf32, #tpu.memory_space<vmem>>, vector<1x128x256xf32>
    %97 = vector.shape_cast %96 : vector<1x128x256xf32> to vector<128x256xf32>
    %cst_33 = arith.constant dense<0.000000e+00> : vector<8x256xf32>
    %98 = tpu.matmul %95, %97, %cst_33 {dimension_numbers = #tpu.dot_dimension_numbers<[1], [0], [0], [1], [0, 0, 1, 1], [], []>} : vector<8x128xf32>, vector<128x256xf32>, vector<8x256xf32> -> vector<8x256xf32>
    %c0_34 = arith.constant 0 : index
    %c0_35 = arith.constant 0 : index
    %c0_36 = arith.constant 0 : index
    %99 = vector.load %arg7[%c0_34, %c0_35, %c0_36] : memref<2x1x256xf32, #tpu.memory_space<vmem>>, vector<1x1x256xf32>
    %100 = vector.shape_cast %99 : vector<1x1x256xf32> to vector<1x256xf32>
    %101 = vector.broadcast %100 : vector<1x256xf32> to vector<8x256xf32>
    %102 = arith.addf %98, %101 : vector<8x256xf32>
    %cst_37 = arith.constant 5.000000e-01 : f32
    %103 = vector.broadcast %cst_37 : f32 to vector<8x256xf32>
    %104 = arith.mulf %103, %102 : vector<8x256xf32>
    %cst_38 = arith.constant 4.471500e-02 : f32
    %105 = vector.broadcast %cst_38 : f32 to vector<8x256xf32>
    %106 = arith.mulf %105, %102 : vector<8x256xf32>
    %107 = arith.mulf %106, %102 : vector<8x256xf32>
    %108 = arith.mulf %107, %102 : vector<8x256xf32>
    %109 = arith.addf %102, %108 : vector<8x256xf32>
    %cst_39 = arith.constant 0.797884583 : f32
    %110 = vector.broadcast %cst_39 : f32 to vector<8x256xf32>
    %111 = arith.mulf %110, %109 : vector<8x256xf32>
    %112 = math.tanh %111 : vector<8x256xf32>
    %cst_40 = arith.constant 1.000000e+00 : f32
    %113 = vector.broadcast %cst_40 : f32 to vector<8x256xf32>
    %114 = arith.addf %113, %112 : vector<8x256xf32>
    %115 = arith.mulf %104, %114 : vector<8x256xf32>
    %c0_41 = arith.constant 0 : index
    %c0_42 = arith.constant 0 : index
    %c0_43 = arith.constant 0 : index
    %116 = vector.load %arg6[%c0_41, %c0_42, %c0_43] : memref<2x256x128xf32, #tpu.memory_space<vmem>>, vector<1x256x128xf32>
    %117 = vector.shape_cast %116 : vector<1x256x128xf32> to vector<256x128xf32>
    %cst_44 = arith.constant dense<0.000000e+00> : vector<8x128xf32>
    %118 = tpu.matmul %115, %117, %cst_44 {dimension_numbers = #tpu.dot_dimension_numbers<[1], [0], [0], [1], [0, 0, 1, 1], [], []>} : vector<8x256xf32>, vector<256x128xf32>, vector<8x128xf32> -> vector<8x128xf32>
    %119 = arith.addf %95, %118 : vector<8x128xf32>
    %120 = vector.extract_strided_slice %3 {offsets = [6, 0], sizes = [1, 128], strides = [1, 1]} : vector<9x128xf32> to vector<1x128xf32>
    %121 = vector.broadcast %120 : vector<1x128xf32> to vector<8x128xf32>
    %122 = arith.addf %119, %121 : vector<8x128xf32>
    %123 = vector.extract_strided_slice %3 {offsets = [7, 0], sizes = [1, 128], strides = [1, 1]} : vector<9x128xf32> to vector<1x128xf32>
    %124 = vector.extract_strided_slice %3 {offsets = [8, 0], sizes = [1, 128], strides = [1, 1]} : vector<9x128xf32> to vector<1x128xf32>
    %cst_45 = arith.constant dense<0.000000e+00> : vector<8xf32>
    %125 = vector.multi_reduction <add>, %122, %cst_45 [1] : vector<8x128xf32> to vector<8xf32>
    %126 = vector.shape_cast %125 : vector<8xf32> to vector<8x1xf32>
    %cst_46 = arith.constant 1.280000e+02 : f32
    %127 = vector.broadcast %cst_46 : f32 to vector<8x1xf32>
    %128 = arith.divf %126, %127 : vector<8x1xf32>
    %129 = arith.mulf %122, %122 : vector<8x128xf32>
    %cst_47 = arith.constant dense<0.000000e+00> : vector<8xf32>
    %130 = vector.multi_reduction <add>, %129, %cst_47 [1] : vector<8x128xf32> to vector<8xf32>
    %131 = vector.shape_cast %130 : vector<8xf32> to vector<8x1xf32>
    %cst_48 = arith.constant 1.280000e+02 : f32
    %132 = vector.broadcast %cst_48 : f32 to vector<8x1xf32>
    %133 = arith.divf %131, %132 : vector<8x1xf32>
    %134 = arith.mulf %128, %128 : vector<8x1xf32>
    %135 = arith.subf %133, %134 : vector<8x1xf32>
    %136 = vector.broadcast %128 : vector<8x1xf32> to vector<8x128xf32>
    %137 = arith.subf %122, %136 : vector<8x128xf32>
    %cst_49 = arith.constant 9.99999996E-13 : f32
    %138 = vector.broadcast %cst_49 : f32 to vector<8x1xf32>
    %139 = arith.addf %135, %138 : vector<8x1xf32>
    %140 = math.rsqrt %139 : vector<8x1xf32>
    %141 = vector.broadcast %140 : vector<8x1xf32> to vector<8x128xf32>
    %142 = arith.mulf %137, %141 : vector<8x128xf32>
    %143 = vector.broadcast %123 : vector<1x128xf32> to vector<8x128xf32>
    %144 = arith.mulf %142, %143 : vector<8x128xf32>
    %145 = vector.broadcast %124 : vector<1x128xf32> to vector<8x128xf32>
    %146 = arith.addf %144, %145 : vector<8x128xf32>
    %c1 = arith.constant 1 : index
    %c0_50 = arith.constant 0 : index
    %c0_51 = arith.constant 0 : index
    %147 = vector.load %arg8[%c1, %c0_50, %c0_51] : memref<2x9x128xf32, #tpu.memory_space<vmem>>, vector<1x9x128xf32>
    %148 = vector.shape_cast %147 : vector<1x9x128xf32> to vector<9x128xf32>
    %c1_52 = arith.constant 1 : index
    %c0_53 = arith.constant 0 : index
    %c0_54 = arith.constant 0 : index
    %149 = vector.load %arg3[%c1_52, %c0_53, %c0_54] : memref<2x128x384xf32, #tpu.memory_space<vmem>>, vector<1x128x384xf32>
    %150 = vector.shape_cast %149 : vector<1x128x384xf32> to vector<128x384xf32>
    %cst_55 = arith.constant dense<0.000000e+00> : vector<8x384xf32>
    %151 = tpu.matmul %146, %150, %cst_55 {dimension_numbers = #tpu.dot_dimension_numbers<[1], [0], [0], [1], [0, 0, 1, 1], [], []>} : vector<8x128xf32>, vector<128x384xf32>, vector<8x384xf32> -> vector<8x384xf32>
    %152 = vector.extract_strided_slice %151 {offsets = [0, 0], sizes = [8, 128], strides = [1, 1]} : vector<8x384xf32> to vector<8x128xf32>
    %153 = vector.extract_strided_slice %148 {offsets = [0, 0], sizes = [1, 128], strides = [1, 1]} : vector<9x128xf32> to vector<1x128xf32>
    %154 = vector.broadcast %153 : vector<1x128xf32> to vector<8x128xf32>
    %155 = arith.addf %152, %154 : vector<8x128xf32>
    %156 = vector.extract_strided_slice %151 {offsets = [0, 128], sizes = [8, 128], strides = [1, 1]} : vector<8x384xf32> to vector<8x128xf32>
    %157 = vector.extract_strided_slice %148 {offsets = [1, 0], sizes = [1, 128], strides = [1, 1]} : vector<9x128xf32> to vector<1x128xf32>
    %158 = vector.broadcast %157 : vector<1x128xf32> to vector<8x128xf32>
    %159 = arith.addf %156, %158 : vector<8x128xf32>
    %160 = vector.extract_strided_slice %151 {offsets = [0, 256], sizes = [8, 128], strides = [1, 1]} : vector<8x384xf32> to vector<8x128xf32>
    %161 = vector.extract_strided_slice %148 {offsets = [2, 0], sizes = [1, 128], strides = [1, 1]} : vector<9x128xf32> to vector<1x128xf32>
    %162 = vector.broadcast %161 : vector<1x128xf32> to vector<8x128xf32>
    %163 = arith.addf %160, %162 : vector<8x128xf32>
    %c0_56 = arith.constant 0 : index
    %c0_57 = arith.constant 0 : index
    %c0_58 = arith.constant 0 : index
    %164 = vector.load %arg2[%c0_56, %c0_57, %c0_58] : memref<1x1x8xf32, #tpu.memory_space<vmem>>, vector<1x1x8xf32>
    %165 = vector.shape_cast %164 : vector<1x1x8xf32> to vector<1x8xf32>
    %166 = vector.extract_strided_slice %155 {offsets = [0, 0], sizes = [8, 32], strides = [1, 1]} : vector<8x128xf32> to vector<8x32xf32>
    %167 = vector.extract_strided_slice %159 {offsets = [0, 0], sizes = [8, 32], strides = [1, 1]} : vector<8x128xf32> to vector<8x32xf32>
    %cst_59 = arith.constant dense<0.000000e+00> : vector<8x8xf32>
    %168 = tpu.matmul %166, %167, %cst_59 {dimension_numbers = #tpu.dot_dimension_numbers<[1], [1], [0], [0], [0, 0, 1, 0], [], []>} : vector<8x32xf32>, vector<8x32xf32>, vector<8x8xf32> -> vector<8x8xf32>
    %169 = vector.broadcast %165 : vector<1x8xf32> to vector<8x8xf32>
    %170 = arith.addf %168, %169 : vector<8x8xf32>
    %171 = vector.extract_strided_slice %155 {offsets = [0, 32], sizes = [8, 32], strides = [1, 1]} : vector<8x128xf32> to vector<8x32xf32>
    %172 = vector.extract_strided_slice %159 {offsets = [0, 32], sizes = [8, 32], strides = [1, 1]} : vector<8x128xf32> to vector<8x32xf32>
    %cst_60 = arith.constant dense<0.000000e+00> : vector<8x8xf32>
    %173 = tpu.matmul %171, %172, %cst_60 {dimension_numbers = #tpu.dot_dimension_numbers<[1], [1], [0], [0], [0, 0, 1, 0], [], []>} : vector<8x32xf32>, vector<8x32xf32>, vector<8x8xf32> -> vector<8x8xf32>
    %174 = vector.broadcast %165 : vector<1x8xf32> to vector<8x8xf32>
    %175 = arith.addf %173, %174 : vector<8x8xf32>
    %176 = vector.extract_strided_slice %155 {offsets = [0, 64], sizes = [8, 32], strides = [1, 1]} : vector<8x128xf32> to vector<8x32xf32>
    %177 = vector.extract_strided_slice %159 {offsets = [0, 64], sizes = [8, 32], strides = [1, 1]} : vector<8x128xf32> to vector<8x32xf32>
    %cst_61 = arith.constant dense<0.000000e+00> : vector<8x8xf32>
    %178 = tpu.matmul %176, %177, %cst_61 {dimension_numbers = #tpu.dot_dimension_numbers<[1], [1], [0], [0], [0, 0, 1, 0], [], []>} : vector<8x32xf32>, vector<8x32xf32>, vector<8x8xf32> -> vector<8x8xf32>
    %179 = vector.broadcast %165 : vector<1x8xf32> to vector<8x8xf32>
    %180 = arith.addf %178, %179 : vector<8x8xf32>
    %181 = vector.extract_strided_slice %155 {offsets = [0, 96], sizes = [8, 32], strides = [1, 1]} : vector<8x128xf32> to vector<8x32xf32>
    %182 = vector.extract_strided_slice %159 {offsets = [0, 96], sizes = [8, 32], strides = [1, 1]} : vector<8x128xf32> to vector<8x32xf32>
    %cst_62 = arith.constant dense<0.000000e+00> : vector<8x8xf32>
    %183 = tpu.matmul %181, %182, %cst_62 {dimension_numbers = #tpu.dot_dimension_numbers<[1], [1], [0], [0], [0, 0, 1, 0], [], []>} : vector<8x32xf32>, vector<8x32xf32>, vector<8x8xf32> -> vector<8x8xf32>
    %184 = vector.broadcast %165 : vector<1x8xf32> to vector<8x8xf32>
    %185 = arith.addf %183, %184 : vector<8x8xf32>
    %186 = tpu.concatenate %170, %175, %180, %185 in 0 : vector<8x8xf32>, vector<8x8xf32>, vector<8x8xf32>, vector<8x8xf32> -> vector<32x8xf32>
    %cst_63 = arith.constant dense<0xFF800000> : vector<32xf32>
    %187 = vector.multi_reduction <maximumf>, %186, %cst_63 [1] : vector<32x8xf32> to vector<32xf32>
    %188 = vector.shape_cast %187 : vector<32xf32> to vector<32x1xf32>
    %189 = vector.broadcast %188 : vector<32x1xf32> to vector<32x8xf32>
    %190 = arith.subf %186, %189 : vector<32x8xf32>
    %191 = math.exp %190 : vector<32x8xf32>
    %cst_64 = arith.constant dense<0.000000e+00> : vector<32xf32>
    %192 = vector.multi_reduction <add>, %191, %cst_64 [1] : vector<32x8xf32> to vector<32xf32>
    %193 = vector.shape_cast %192 : vector<32xf32> to vector<32x1xf32>
    %194 = tpu.reciprocal %193 {approx = true} : vector<32x1xf32> -> vector<32x1xf32>
    %195 = vector.broadcast %194 : vector<32x1xf32> to vector<32x8xf32>
    %196 = arith.mulf %191, %195 : vector<32x8xf32>
    %197 = vector.extract_strided_slice %196 {offsets = [0, 0], sizes = [8, 8], strides = [1, 1]} : vector<32x8xf32> to vector<8x8xf32>
    %198 = vector.extract_strided_slice %163 {offsets = [0, 0], sizes = [8, 32], strides = [1, 1]} : vector<8x128xf32> to vector<8x32xf32>
    %cst_65 = arith.constant dense<0.000000e+00> : vector<8x32xf32>
    %199 = tpu.matmul %197, %198, %cst_65 {dimension_numbers = #tpu.dot_dimension_numbers<[1], [0], [0], [1], [0, 0, 1, 1], [], []>} : vector<8x8xf32>, vector<8x32xf32>, vector<8x32xf32> -> vector<8x32xf32>
    %200 = vector.extract_strided_slice %196 {offsets = [8, 0], sizes = [8, 8], strides = [1, 1]} : vector<32x8xf32> to vector<8x8xf32>
    %201 = vector.extract_strided_slice %163 {offsets = [0, 32], sizes = [8, 32], strides = [1, 1]} : vector<8x128xf32> to vector<8x32xf32>
    %cst_66 = arith.constant dense<0.000000e+00> : vector<8x32xf32>
    %202 = tpu.matmul %200, %201, %cst_66 {dimension_numbers = #tpu.dot_dimension_numbers<[1], [0], [0], [1], [0, 0, 1, 1], [], []>} : vector<8x8xf32>, vector<8x32xf32>, vector<8x32xf32> -> vector<8x32xf32>
    %203 = vector.extract_strided_slice %196 {offsets = [16, 0], sizes = [8, 8], strides = [1, 1]} : vector<32x8xf32> to vector<8x8xf32>
    %204 = vector.extract_strided_slice %163 {offsets = [0, 64], sizes = [8, 32], strides = [1, 1]} : vector<8x128xf32> to vector<8x32xf32>
    %cst_67 = arith.constant dense<0.000000e+00> : vector<8x32xf32>
    %205 = tpu.matmul %203, %204, %cst_67 {dimension_numbers = #tpu.dot_dimension_numbers<[1], [0], [0], [1], [0, 0, 1, 1], [], []>} : vector<8x8xf32>, vector<8x32xf32>, vector<8x32xf32> -> vector<8x32xf32>
    %206 = vector.extract_strided_slice %196 {offsets = [24, 0], sizes = [8, 8], strides = [1, 1]} : vector<32x8xf32> to vector<8x8xf32>
    %207 = vector.extract_strided_slice %163 {offsets = [0, 96], sizes = [8, 32], strides = [1, 1]} : vector<8x128xf32> to vector<8x32xf32>
    %cst_68 = arith.constant dense<0.000000e+00> : vector<8x32xf32>
    %208 = tpu.matmul %206, %207, %cst_68 {dimension_numbers = #tpu.dot_dimension_numbers<[1], [0], [0], [1], [0, 0, 1, 1], [], []>} : vector<8x8xf32>, vector<8x32xf32>, vector<8x32xf32> -> vector<8x32xf32>
    %209 = tpu.concatenate %199, %202, %205, %208 in 1 : vector<8x32xf32>, vector<8x32xf32>, vector<8x32xf32>, vector<8x32xf32> -> vector<8x128xf32>
    %c1_69 = arith.constant 1 : index
    %c0_70 = arith.constant 0 : index
    %c0_71 = arith.constant 0 : index
    %210 = vector.load %arg4[%c1_69, %c0_70, %c0_71] : memref<2x128x128xf32, #tpu.memory_space<vmem>>, vector<1x128x128xf32>
    %211 = vector.shape_cast %210 : vector<1x128x128xf32> to vector<128x128xf32>
    %cst_72 = arith.constant dense<0.000000e+00> : vector<8x128xf32>
    %212 = tpu.matmul %209, %211, %cst_72 {dimension_numbers = #tpu.dot_dimension_numbers<[1], [0], [0], [1], [0, 0, 1, 1], [], []>} : vector<8x128xf32>, vector<128x128xf32>, vector<8x128xf32> -> vector<8x128xf32>
    %213 = vector.extract_strided_slice %148 {offsets = [3, 0], sizes = [1, 128], strides = [1, 1]} : vector<9x128xf32> to vector<1x128xf32>
    %214 = vector.broadcast %213 : vector<1x128xf32> to vector<8x128xf32>
    %215 = arith.addf %212, %214 : vector<8x128xf32>
    %216 = arith.addf %146, %215 : vector<8x128xf32>
    %217 = vector.extract_strided_slice %148 {offsets = [4, 0], sizes = [1, 128], strides = [1, 1]} : vector<9x128xf32> to vector<1x128xf32>
    %218 = vector.extract_strided_slice %148 {offsets = [5, 0], sizes = [1, 128], strides = [1, 1]} : vector<9x128xf32> to vector<1x128xf32>
    %cst_73 = arith.constant dense<0.000000e+00> : vector<8xf32>
    %219 = vector.multi_reduction <add>, %216, %cst_73 [1] : vector<8x128xf32> to vector<8xf32>
    %220 = vector.shape_cast %219 : vector<8xf32> to vector<8x1xf32>
    %cst_74 = arith.constant 1.280000e+02 : f32
    %221 = vector.broadcast %cst_74 : f32 to vector<8x1xf32>
    %222 = arith.divf %220, %221 : vector<8x1xf32>
    %223 = arith.mulf %216, %216 : vector<8x128xf32>
    %cst_75 = arith.constant dense<0.000000e+00> : vector<8xf32>
    %224 = vector.multi_reduction <add>, %223, %cst_75 [1] : vector<8x128xf32> to vector<8xf32>
    %225 = vector.shape_cast %224 : vector<8xf32> to vector<8x1xf32>
    %cst_76 = arith.constant 1.280000e+02 : f32
    %226 = vector.broadcast %cst_76 : f32 to vector<8x1xf32>
    %227 = arith.divf %225, %226 : vector<8x1xf32>
    %228 = arith.mulf %222, %222 : vector<8x1xf32>
    %229 = arith.subf %227, %228 : vector<8x1xf32>
    %230 = vector.broadcast %222 : vector<8x1xf32> to vector<8x128xf32>
    %231 = arith.subf %216, %230 : vector<8x128xf32>
    %cst_77 = arith.constant 9.99999996E-13 : f32
    %232 = vector.broadcast %cst_77 : f32 to vector<8x1xf32>
    %233 = arith.addf %229, %232 : vector<8x1xf32>
    %234 = math.rsqrt %233 : vector<8x1xf32>
    %235 = vector.broadcast %234 : vector<8x1xf32> to vector<8x128xf32>
    %236 = arith.mulf %231, %235 : vector<8x128xf32>
    %237 = vector.broadcast %217 : vector<1x128xf32> to vector<8x128xf32>
    %238 = arith.mulf %236, %237 : vector<8x128xf32>
    %239 = vector.broadcast %218 : vector<1x128xf32> to vector<8x128xf32>
    %240 = arith.addf %238, %239 : vector<8x128xf32>
    %c1_78 = arith.constant 1 : index
    %c0_79 = arith.constant 0 : index
    %c0_80 = arith.constant 0 : index
    %241 = vector.load %arg5[%c1_78, %c0_79, %c0_80] : memref<2x128x256xf32, #tpu.memory_space<vmem>>, vector<1x128x256xf32>
    %242 = vector.shape_cast %241 : vector<1x128x256xf32> to vector<128x256xf32>
    %cst_81 = arith.constant dense<0.000000e+00> : vector<8x256xf32>
    %243 = tpu.matmul %240, %242, %cst_81 {dimension_numbers = #tpu.dot_dimension_numbers<[1], [0], [0], [1], [0, 0, 1, 1], [], []>} : vector<8x128xf32>, vector<128x256xf32>, vector<8x256xf32> -> vector<8x256xf32>
    %c1_82 = arith.constant 1 : index
    %c0_83 = arith.constant 0 : index
    %c0_84 = arith.constant 0 : index
    %244 = vector.load %arg7[%c1_82, %c0_83, %c0_84] : memref<2x1x256xf32, #tpu.memory_space<vmem>>, vector<1x1x256xf32>
    %245 = vector.shape_cast %244 : vector<1x1x256xf32> to vector<1x256xf32>
    %246 = vector.broadcast %245 : vector<1x256xf32> to vector<8x256xf32>
    %247 = arith.addf %243, %246 : vector<8x256xf32>
    %cst_85 = arith.constant 5.000000e-01 : f32
    %248 = vector.broadcast %cst_85 : f32 to vector<8x256xf32>
    %249 = arith.mulf %248, %247 : vector<8x256xf32>
    %cst_86 = arith.constant 4.471500e-02 : f32
    %250 = vector.broadcast %cst_86 : f32 to vector<8x256xf32>
    %251 = arith.mulf %250, %247 : vector<8x256xf32>
    %252 = arith.mulf %251, %247 : vector<8x256xf32>
    %253 = arith.mulf %252, %247 : vector<8x256xf32>
    %254 = arith.addf %247, %253 : vector<8x256xf32>
    %cst_87 = arith.constant 0.797884583 : f32
    %255 = vector.broadcast %cst_87 : f32 to vector<8x256xf32>
    %256 = arith.mulf %255, %254 : vector<8x256xf32>
    %257 = math.tanh %256 : vector<8x256xf32>
    %cst_88 = arith.constant 1.000000e+00 : f32
    %258 = vector.broadcast %cst_88 : f32 to vector<8x256xf32>
    %259 = arith.addf %258, %257 : vector<8x256xf32>
    %260 = arith.mulf %249, %259 : vector<8x256xf32>
    %c1_89 = arith.constant 1 : index
    %c0_90 = arith.constant 0 : index
    %c0_91 = arith.constant 0 : index
    %261 = vector.load %arg6[%c1_89, %c0_90, %c0_91] : memref<2x256x128xf32, #tpu.memory_space<vmem>>, vector<1x256x128xf32>
    %262 = vector.shape_cast %261 : vector<1x256x128xf32> to vector<256x128xf32>
    %cst_92 = arith.constant dense<0.000000e+00> : vector<8x128xf32>
    %263 = tpu.matmul %260, %262, %cst_92 {dimension_numbers = #tpu.dot_dimension_numbers<[1], [0], [0], [1], [0, 0, 1, 1], [], []>} : vector<8x256xf32>, vector<256x128xf32>, vector<8x128xf32> -> vector<8x128xf32>
    %264 = arith.addf %240, %263 : vector<8x128xf32>
    %265 = vector.extract_strided_slice %148 {offsets = [6, 0], sizes = [1, 128], strides = [1, 1]} : vector<9x128xf32> to vector<1x128xf32>
    %266 = vector.broadcast %265 : vector<1x128xf32> to vector<8x128xf32>
    %267 = arith.addf %264, %266 : vector<8x128xf32>
    %268 = vector.extract_strided_slice %148 {offsets = [7, 0], sizes = [1, 128], strides = [1, 1]} : vector<9x128xf32> to vector<1x128xf32>
    %269 = vector.extract_strided_slice %148 {offsets = [8, 0], sizes = [1, 128], strides = [1, 1]} : vector<9x128xf32> to vector<1x128xf32>
    %cst_93 = arith.constant dense<0.000000e+00> : vector<8xf32>
    %270 = vector.multi_reduction <add>, %267, %cst_93 [1] : vector<8x128xf32> to vector<8xf32>
    %271 = vector.shape_cast %270 : vector<8xf32> to vector<8x1xf32>
    %cst_94 = arith.constant 1.280000e+02 : f32
    %272 = vector.broadcast %cst_94 : f32 to vector<8x1xf32>
    %273 = arith.divf %271, %272 : vector<8x1xf32>
    %274 = arith.mulf %267, %267 : vector<8x128xf32>
    %cst_95 = arith.constant dense<0.000000e+00> : vector<8xf32>
    %275 = vector.multi_reduction <add>, %274, %cst_95 [1] : vector<8x128xf32> to vector<8xf32>
    %276 = vector.shape_cast %275 : vector<8xf32> to vector<8x1xf32>
    %cst_96 = arith.constant 1.280000e+02 : f32
    %277 = vector.broadcast %cst_96 : f32 to vector<8x1xf32>
    %278 = arith.divf %276, %277 : vector<8x1xf32>
    %279 = arith.mulf %273, %273 : vector<8x1xf32>
    %280 = arith.subf %278, %279 : vector<8x1xf32>
    %281 = vector.broadcast %273 : vector<8x1xf32> to vector<8x128xf32>
    %282 = arith.subf %267, %281 : vector<8x128xf32>
    %cst_97 = arith.constant 9.99999996E-13 : f32
    %283 = vector.broadcast %cst_97 : f32 to vector<8x1xf32>
    %284 = arith.addf %280, %283 : vector<8x1xf32>
    %285 = math.rsqrt %284 : vector<8x1xf32>
    %286 = vector.broadcast %285 : vector<8x1xf32> to vector<8x128xf32>
    %287 = arith.mulf %282, %286 : vector<8x128xf32>
    %288 = vector.broadcast %268 : vector<1x128xf32> to vector<8x128xf32>
    %289 = arith.mulf %287, %288 : vector<8x128xf32>
    %290 = vector.broadcast %269 : vector<1x128xf32> to vector<8x128xf32>
    %291 = arith.addf %289, %290 : vector<8x128xf32>
    %c0_98 = arith.constant 0 : index
    %c0_99 = arith.constant 0 : index
    %c0_100 = arith.constant 0 : index
    %292 = vector.load %arg9[%c0_98, %c0_99, %c0_100] : memref<2x128x128xf32, #tpu.memory_space<vmem>>, vector<1x128x128xf32>
    %293 = vector.shape_cast %292 : vector<1x128x128xf32> to vector<128x128xf32>
    %c1_101 = arith.constant 1 : index
    %c0_102 = arith.constant 0 : index
    %c0_103 = arith.constant 0 : index
    %294 = vector.load %arg9[%c1_101, %c0_102, %c0_103] : memref<2x128x128xf32, #tpu.memory_space<vmem>>, vector<1x128x128xf32>
    %295 = vector.shape_cast %294 : vector<1x128x128xf32> to vector<128x128xf32>
    %c0_104 = arith.constant 0 : index
    %c0_105 = arith.constant 0 : index
    %296 = vector.load %arg10[%c0_104, %c0_105] : memref<4x128xf32, #tpu.memory_space<vmem>>, vector<4x128xf32>
    %297 = vector.extract_strided_slice %296 {offsets = [0, 0], sizes = [1, 128], strides = [1, 1]} : vector<4x128xf32> to vector<1x128xf32>
    %298 = vector.extract_strided_slice %296 {offsets = [1, 0], sizes = [1, 128], strides = [1, 1]} : vector<4x128xf32> to vector<1x128xf32>
    %299 = vector.extract_strided_slice %296 {offsets = [2, 0], sizes = [1, 128], strides = [1, 1]} : vector<4x128xf32> to vector<1x128xf32>
    %300 = vector.extract_strided_slice %296 {offsets = [3, 0], sizes = [1, 128], strides = [1, 1]} : vector<4x128xf32> to vector<1x128xf32>
    %301 = vector.extract_strided_slice %291 {offsets = [0, 0], sizes = [1, 128], strides = [1, 1]} : vector<8x128xf32> to vector<1x128xf32>
    %cst_106 = arith.constant dense<0.000000e+00> : vector<1x128xf32>
    %302 = tpu.matmul %301, %293, %cst_106 {dimension_numbers = #tpu.dot_dimension_numbers<[1], [0], [0], [1], [0, 0, 1, 1], [], []>} : vector<1x128xf32>, vector<128x128xf32>, vector<1x128xf32> -> vector<1x128xf32>
    %303 = arith.addf %302, %297 : vector<1x128xf32>
    %304 = math.tanh %303 : vector<1x128xf32>
    %cst_107 = arith.constant dense<0.000000e+00> : vector<1x8xf32>
    %305 = tpu.matmul %304, %291, %cst_107 {dimension_numbers = #tpu.dot_dimension_numbers<[1], [1], [0], [0], [0, 0, 1, 0], [], []>} : vector<1x128xf32>, vector<8x128xf32>, vector<1x8xf32> -> vector<1x8xf32>
    %c0_108 = arith.constant 0 : index
    %c0_109 = arith.constant 0 : index
    %c0_110 = arith.constant 0 : index
    %306 = vector.load %arg2[%c0_108, %c0_109, %c0_110] : memref<1x1x8xf32, #tpu.memory_space<vmem>>, vector<1x1x8xf32>
    %307 = vector.shape_cast %306 : vector<1x1x8xf32> to vector<1x8xf32>
    %cst_111 = arith.constant 0.000000e+00 : f32
    %308 = vector.broadcast %cst_111 : f32 to vector<1x8xf32>
    %309 = arith.cmpf olt, %307, %308 : vector<1x8xf32>
    %cst_112 = arith.constant -1.000000e+09 : f32
    %310 = vector.broadcast %cst_112 : f32 to vector<1x8xf32>
    %311 = arith.select %309, %310, %305 : vector<1x8xi1>, vector<1x8xf32>
    %cst_113 = arith.constant dense<0xFF800000> : vector<1xf32>
    %312 = vector.multi_reduction <maximumf>, %311, %cst_113 [1] : vector<1x8xf32> to vector<1xf32>
    %313 = vector.shape_cast %312 : vector<1xf32> to vector<1x1xf32>
    %314 = vector.broadcast %313 : vector<1x1xf32> to vector<1x8xf32>
    %315 = arith.subf %311, %314 : vector<1x8xf32>
    %316 = math.exp %315 : vector<1x8xf32>
    %cst_114 = arith.constant dense<0.000000e+00> : vector<1xf32>
    %317 = vector.multi_reduction <add>, %316, %cst_114 [1] : vector<1x8xf32> to vector<1xf32>
    %318 = vector.shape_cast %317 : vector<1xf32> to vector<1x1xf32>
    %319 = tpu.reciprocal %318 {approx = true} : vector<1x1xf32> -> vector<1x1xf32>
    %320 = vector.broadcast %319 : vector<1x1xf32> to vector<1x8xf32>
    %321 = arith.mulf %316, %320 : vector<1x8xf32>
    %cst_115 = arith.constant dense<0.000000e+00> : vector<1x128xf32>
    %322 = tpu.matmul %321, %291, %cst_115 {dimension_numbers = #tpu.dot_dimension_numbers<[1], [0], [0], [1], [0, 0, 1, 1], [], []>} : vector<1x8xf32>, vector<8x128xf32>, vector<1x128xf32> -> vector<1x128xf32>
    %323 = arith.addf %304, %322 : vector<1x128xf32>
    %cst_116 = arith.constant dense<0.000000e+00> : vector<1xf32>
    %324 = vector.multi_reduction <add>, %323, %cst_116 [1] : vector<1x128xf32> to vector<1xf32>
    %325 = vector.shape_cast %324 : vector<1xf32> to vector<1x1xf32>
    %cst_117 = arith.constant 1.280000e+02 : f32
    %326 = vector.broadcast %cst_117 : f32 to vector<1x1xf32>
    %327 = arith.divf %325, %326 : vector<1x1xf32>
    %328 = arith.mulf %323, %323 : vector<1x128xf32>
    %cst_118 = arith.constant dense<0.000000e+00> : vector<1xf32>
    %329 = vector.multi_reduction <add>, %328, %cst_118 [1] : vector<1x128xf32> to vector<1xf32>
    %330 = vector.shape_cast %329 : vector<1xf32> to vector<1x1xf32>
    %cst_119 = arith.constant 1.280000e+02 : f32
    %331 = vector.broadcast %cst_119 : f32 to vector<1x1xf32>
    %332 = arith.divf %330, %331 : vector<1x1xf32>
    %333 = arith.mulf %327, %327 : vector<1x1xf32>
    %334 = arith.subf %332, %333 : vector<1x1xf32>
    %335 = vector.broadcast %327 : vector<1x1xf32> to vector<1x128xf32>
    %336 = arith.subf %323, %335 : vector<1x128xf32>
    %cst_120 = arith.constant 9.99999974E-6 : f32
    %337 = vector.broadcast %cst_120 : f32 to vector<1x1xf32>
    %338 = arith.addf %334, %337 : vector<1x1xf32>
    %339 = math.rsqrt %338 : vector<1x1xf32>
    %340 = vector.broadcast %339 : vector<1x1xf32> to vector<1x128xf32>
    %341 = arith.mulf %336, %340 : vector<1x128xf32>
    %342 = arith.mulf %341, %298 : vector<1x128xf32>
    %343 = arith.addf %342, %299 : vector<1x128xf32>
    %cst_121 = arith.constant dense<0.000000e+00> : vector<1x128xf32>
    %344 = tpu.matmul %343, %295, %cst_121 {dimension_numbers = #tpu.dot_dimension_numbers<[1], [0], [0], [1], [0, 0, 1, 1], [], []>} : vector<1x128xf32>, vector<128x128xf32>, vector<1x128xf32> -> vector<1x128xf32>
    %345 = arith.addf %344, %300 : vector<1x128xf32>
    %c0_122 = arith.constant 0 : index
    %c0_123 = arith.constant 0 : index
    %c0_124 = arith.constant 0 : index
    %346 = vector.load %arg11[%c0_122, %c0_123, %c0_124] : memref<1x1x128xf32, #tpu.memory_space<vmem>>, vector<1x1x128xf32>
    %347 = vector.shape_cast %346 : vector<1x1x128xf32> to vector<1x128xf32>
    %348 = vector.shape_cast %345 : vector<1x128xf32> to vector<1x1x128xf32>
    tpu.vector_store %arg11[%c0_122, %c0_123, %c0_124], %348 {strides = array<i32>} : memref<1x1x128xf32, #tpu.memory_space<vmem>>, vector<1x1x128xf32>,
    return
  }
  func.func @transform_0(%arg0: i32) -> (i32, i32, i32) {
    %c0_i32 = arith.constant 0 : i32
    %c0_i32_0 = arith.constant 0 : i32
    %c0_i32_1 = arith.constant 0 : i32
    return %arg0, %c0_i32, %c0_i32_0 : i32, i32, i32
  }
  func.func @transform_1(%arg0: i32) -> (i32, i32, i32) {
    %c0_i32 = arith.constant 0 : i32
    %c0_i32_0 = arith.constant 0 : i32
    %c0_i32_1 = arith.constant 0 : i32
    return %arg0, %c0_i32, %c0_i32_0 : i32, i32, i32
  }
  func.func @transform_2(%arg0: i32) -> (i32, i32, i32) {
    %c0_i32 = arith.constant 0 : i32
    %c0_i32_0 = arith.constant 0 : i32
    %c0_i32_1 = arith.constant 0 : i32
    %c0_i32_2 = arith.constant 0 : i32
    return %c0_i32, %c0_i32_0, %c0_i32_1 : i32, i32, i32
  }
  func.func @transform_3(%arg0: i32) -> (i32, i32, i32) {
    %c0_i32 = arith.constant 0 : i32
    %c0_i32_0 = arith.constant 0 : i32
    %c0_i32_1 = arith.constant 0 : i32
    %c0_i32_2 = arith.constant 0 : i32
    return %c0_i32, %c0_i32_0, %c0_i32_1 : i32, i32, i32
  }
  func.func @transform_4(%arg0: i32) -> (i32, i32, i32) {
    %c0_i32 = arith.constant 0 : i32
    %c0_i32_0 = arith.constant 0 : i32
    %c0_i32_1 = arith.constant 0 : i32
    %c0_i32_2 = arith.constant 0 : i32
    return %c0_i32, %c0_i32_0, %c0_i32_1 : i32, i32, i32
  }
  func.func @transform_5(%arg0: i32) -> (i32, i32, i32) {
    %c0_i32 = arith.constant 0 : i32
    %c0_i32_0 = arith.constant 0 : i32
    %c0_i32_1 = arith.constant 0 : i32
    %c0_i32_2 = arith.constant 0 : i32
    return %c0_i32, %c0_i32_0, %c0_i32_1 : i32, i32, i32
  }
  func.func @transform_6(%arg0: i32) -> (i32, i32, i32) {
    %c0_i32 = arith.constant 0 : i32
    %c0_i32_0 = arith.constant 0 : i32
    %c0_i32_1 = arith.constant 0 : i32
    %c0_i32_2 = arith.constant 0 : i32
    return %c0_i32, %c0_i32_0, %c0_i32_1 : i32, i32, i32
  }
  func.func @transform_7(%arg0: i32) -> (i32, i32, i32) {
    %c0_i32 = arith.constant 0 : i32
    %c0_i32_0 = arith.constant 0 : i32
    %c0_i32_1 = arith.constant 0 : i32
    %c0_i32_2 = arith.constant 0 : i32
    return %c0_i32, %c0_i32_0, %c0_i32_1 : i32, i32, i32
  }
  func.func @transform_8(%arg0: i32) -> (i32, i32, i32) {
    %c0_i32 = arith.constant 0 : i32
    %c0_i32_0 = arith.constant 0 : i32
    %c0_i32_1 = arith.constant 0 : i32
    %c0_i32_2 = arith.constant 0 : i32
    return %c0_i32, %c0_i32_0, %c0_i32_1 : i32, i32, i32
  }
  func.func @transform_9(%arg0: i32) -> (i32, i32) {
    %c0_i32 = arith.constant 0 : i32
    %c0_i32_0 = arith.constant 0 : i32
    %c0_i32_1 = arith.constant 0 : i32
    return %c0_i32, %c0_i32_0 : i32, i32
  }
  func.func @transform_10(%arg0: i32) -> (i32, i32, i32) {
    %c0_i32 = arith.constant 0 : i32
    %c0_i32_0 = arith.constant 0 : i32
    %c0_i32_1 = arith.constant 0 : i32
    return %arg0, %c0_i32, %c0_i32_0 : i32, i32, i32
  }
}

</mosaic_0001>

<bundles_post_ra>
// kernel: model_forward.1
= control target key start
LH: loop header
LB: loop body
LE: loop exit
PB: predicated region body
PF: predicated region fallthrough
CT: control target
= control target key end

     0   :  { %15 = vsyncpa [#allocation3], 0  ;;  %s5220_s0 = inlined_call_operand.vmem [shape: f32[2,8,128], index: 0, kind: input, shape index: {}]   ;;  %s5221_s1 = inlined_call_operand.vmem [shape: f32[2,1,8], index: 1, kind: input, shape index: {}]   ;;  %s5222_s2 = inlined_call_operand.hbm [shape: f32[2,128,384], index: 2, kind: input, shape index: {}]   ;;  %s5223_s3 = inlined_call_operand.vmem [shape: f32[2,128,128], index: 3, kind: input, shape index: {}]   ;;  %s5224_s4 = inlined_call_operand.hbm [shape: f32[2,128,256], index: 4, kind: input, shape index: {}]   ;;  %s5225_s5 = inlined_call_operand.hbm [shape: f32[2,256,128], index: 5, kind: input, shape index: {}]   ;;  %s5226_s6 = inlined_call_operand.vmem [shape: f32[2,1,256], index: 6, kind: input, shape index: {}]   ;;  %s5227_s7 = inlined_call_operand.vmem [shape: f32[2,9,128], index: 7, kind: input, shape index: {}]   ;;  %s5228_s8 = inlined_call_operand.hbm [shape: f32[2,128,128], index: 8, kind: input, shape index: {}]   ;;  %s5229_s9 = inlined_call_operand.vmem [shape: f32[4,128], index: 9, kind: input, shape index: {}]   ;;  %s5230_s10 = inlined_call_operand.vmem [shape: f32[2,1,128], index: 10, kind: output, shape index: {}]  }
   0x1   :  { %16 = vsyncpa [#allocation5], 0 }
   0x2   :  { %17 = vsyncpa [#allocation8], 0  ;;  %s4639_s13 = smov 0  }
   0x3 LB: > { %s4568_s14 = smov [#allocation4]   ;;  %s4645_s16 = sadd.s32 4294967295, %s4566_s13   ;;  %s4566_s13 = sphi %s4639_s13, %s23_s13  }
   0x4   : > { %s302_s15 = sshll.u32 %s4568_s14, 4  ;;  %p3413_p0 = scmp.ge.s32.totalorder %s4566_s13, 1  ;;  %s4650_s15 = int_to_ptr.vmem [resolvable:$true] %s302_s15 }
   0x5   : > { %p274_p1 = scmp.lt.s32.totalorder %s4566_s13, 3  ;;  %p5231_p2 = scmp.eq.s32.totalorder %s4645_s16, 0 }
   0x6   : > { %s4569_s18 = smov [#allocation2]   ;;  %s4570_s21 = smov [#allocation6]  }
   0x7   : > { %p4652_p3 = pnand %p3413_p0, %p274_p1  ;;  %s286_s19 = sshll.u32 %s4569_s18, 4  ;;  %s4658_s19 = int_to_ptr.vmem [resolvable:$true] %s286_s19 }
   0x8   : > { %s4666_s22 = sshll.u32 %s4570_s21, 4  ;;  %s4436_s25 = scalar_lea.hbm %s5224_s4, 8192  ;;  %s316_s22 = int_to_ptr.vmem [resolvable:$true] %s4666_s22 }
   0x9   : > { %s5233_s17 = scalar_select %p4652_p3, 1, 0 }
   0xa   : > { %p4333_p4 = pneg %p4652_p3  ;;  %p4437_p6 = scmp.ne.s32.totalorder %s5224_s4, %s4436_s25 }
   0xb   : > { %p4443_p10 = scmp.lt.u32.totalorder %s4436_s25, %s5224_s4 }
   0xc   : > { %p4662_p5 = pnand %p5231_p2, %p4333_p4 }
   0xe   : > { %p4676_p7 = pneg %p4662_p5 }
  0x10   : > { %p4439_p8 = pnand %p4676_p7, %p4437_p6 }
  0x12   : > { %p4440_p9 = pneg %p4439_p8 }
  0x14   : > { %p4445_p11 = pnand %p4443_p10, %p4440_p9 }
  0x16   : > { %4448 = shalt.err (!%p4445_p11)
}
  0x17   : > { %s4449_s11 = scalar_lea.vmem %s4650_s15, 8192  ;;  %p4457_p1 = scmp.lt.s32.totalorder %s4650_s15, %s4650_s15 }
  0x18   : > { %p4450_p12 = scmp.ne.s32.totalorder %s4650_s15, %s4449_s11  ;;  %p4458_p4 = scmp.lt.s32.totalorder %s4449_s11, %s4449_s11 }
  0x1a   : > { %p4452_p13 = pnand %p4450_p12, %p4676_p7  ;;  %p4459_p6 = por %p4458_p4, %p4457_p1 }
  0x1c   : > { %p4453_p0 = pneg %p4452_p13 }
  0x1e   : > { %p4460_p8 = pnand %p4459_p6, %p4453_p0 }
  0x20   : > { %4463 = shalt.err (!%p4460_p8)
}
  0x21   : > { %s4571_s12 = smov 256   ;;  %s4572_s14 = smov 16  }
  0x22   : > { %4339 = dma.hbm_to_vmem [thread:$0]  (!%p4662_p5), %s5224_s4, 8192, %s4650_s15, [#allocation5], %s4571_s12, %s4571_s12, %s4572_s14  }
  0x23   : > { %s4464_s25 = scalar_lea.hbm %s5222_s2, 12288 }
  0x24   : > { %p4465_p9 = scmp.ne.s32.totalorder %s5222_s2, %s4464_s25  ;;  %p4471_p12 = scmp.lt.u32.totalorder %s4464_s25, %s5222_s2 }
  0x26   : > { %p4467_p10 = pnand %p4465_p9, %p4676_p7 }
  0x28   : > { %p4468_p11 = pneg %p4467_p10 }
  0x2a   : > { %p4473_p13 = pnand %p4471_p12, %p4468_p11 }
  0x2c   : > { %4476 = shalt.err (!%p4473_p13)
}
  0x2d   : > { %s4477_s15 = scalar_lea.vmem %s4658_s19, 12288  ;;  %p4485_p6 = scmp.lt.s32.totalorder %s4658_s19, %s4658_s19 }
  0x2e   : > { %p4478_p0 = scmp.ne.s32.totalorder %s4658_s19, %s4477_s15  ;;  %p4486_p8 = scmp.lt.s32.totalorder %s4477_s15, %s4477_s15 }
  0x30   : > { %p4480_p1 = pnand %p4478_p0, %p4676_p7  ;;  %p4487_p9 = por %p4486_p8, %p4485_p6 }
  0x32   : > { %p4481_p4 = pneg %p4480_p1 }
  0x34   : > { %p4488_p10 = pnand %p4487_p9, %p4481_p4 }
  0x36   : > { %4491 = shalt.err (!%p4488_p10)
}
  0x37   : > { %s4573_s11 = smov 384   ;;  %s4574_s12 = smov 24  }
  0x38   : > { %4336 = dma.hbm_to_vmem [thread:$0]  (!%p4662_p5), %s5222_s2, 12288, %s4658_s19, [#allocation3], %s4573_s11, %s4573_s11, %s4574_s12  }
  0x39   : > { %s4492_s24 = scalar_lea.hbm %s5225_s5, 8192 }
  0x3a   : > { %p4493_p11 = scmp.ne.s32.totalorder %s5225_s5, %s4492_s24  ;;  %p4499_p0 = scmp.lt.u32.totalorder %s4492_s24, %s5225_s5 }
  0x3c   : > { %p4495_p12 = pnand %p4493_p11, %p4676_p7 }
  0x3e   : > { %p4496_p13 = pneg %p4495_p12 }
  0x40   : > { %p4501_p1 = pnand %p4499_p0, %p4496_p13 }
  0x42   : > { %4504 = shalt.err (!%p4501_p1)
}
  0x43   : > { %s4505_s30 = scalar_lea.vmem %s316_s22, 8192  ;;  %p4513_p9 = scmp.lt.s32.totalorder %s316_s22, %s316_s22 }
  0x44   : > { %p4506_p4 = scmp.ne.s32.totalorder %s316_s22, %s4505_s30  ;;  %p4514_p10 = scmp.lt.s32.totalorder %s4505_s30, %s4505_s30 }
  0x46   : > { %p4508_p6 = pnand %p4506_p4, %p4676_p7  ;;  %p4515_p2 = por %p4514_p10, %p4513_p9 }
  0x48   : > { %p4509_p8 = pneg %p4508_p6 }
  0x4a   : > { %p4516_p3 = pnand %p4515_p2, %p4509_p8 }
  0x4c   : > { %4519 = shalt.err (!%p4516_p3)
}
  0x4d   : > { %s4575_s19 = smov 128   ;;  %s4576_s15 = smov 8  }
  0x4e   : > { %4342 = dma.hbm_to_vmem [thread:$0]  (!%p4662_p5), %s5225_s5, 8192, %s316_s22, [#allocation5], %s4575_s19, %s4575_s19, %s4576_s15  }
  0x4f   : > { %s4577_s14 = smov [#allocation7]   ;;  %s4520_s24 = scalar_lea.hbm %s5228_s8, 4096 }
  0x50   : > { %s334_s18 = sshll.u32 %s4577_s14, 4  ;;  %p4521_p2 = scmp.ne.s32.totalorder %s5228_s8, %s4520_s24  ;;  %s335_s18 = int_to_ptr.vmem [resolvable:$true] %s334_s18 }
  0x51   : > { %p4527_p12 = scmp.lt.u32.totalorder %s4520_s24, %s5228_s8 }
  0x52   : > { %p4523_p3 = pnand %p4521_p2, %p4676_p7 }
  0x54   : > { %p4524_p11 = pneg %p4523_p3 }
  0x56   : > { %p4529_p13 = pnand %p4527_p12, %p4524_p11 }
  0x58   : > { %4532 = shalt.err (!%p4529_p13)
}
  0x59   : > { %s4533_s22 = scalar_lea.vmem %s335_s18, 4096  ;;  %p4541_p6 = scmp.lt.s32.totalorder %s335_s18, %s335_s18 }
  0x5a   : > { %p4534_p0 = scmp.ne.s32.totalorder %s335_s18, %s4533_s22  ;;  %p4542_p8 = scmp.lt.s32.totalorder %s4533_s22, %s4533_s22 }
  0x5c   : > { %p4536_p1 = pnand %p4534_p0, %p4676_p7  ;;  %p4543_p9 = por %p4542_p8, %p4541_p6 }
  0x5e   : > { %p4537_p4 = pneg %p4536_p1 }
  0x60   : > { %p4544_p10 = pnand %p4543_p9, %p4537_p4 }
  0x62   : > { %4547 = shalt.err (!%p4544_p10)
}
  0x63   : > { %4345 = dma.hbm_to_vmem [thread:$0]  (!%p4662_p5), %s5228_s8, 4096, %s335_s18, [#allocation8], %s4575_s19, %s4575_s19, %s4576_s15  }
  0x64   : > { %p5236_p2 = scmp.ne.s32.totalorder %s5233_s17, 0 }
  0x65   : > { %p5237_p3 = scmp.eq.s32.totalorder (!%p5236_p2), %s4645_s16, 0 }
  0x66   : > { %366 = sbr.rel (%p5236_p2) target bundleno = 5921 (0x1721), region = 60 }
  0x6d   : > { %4553 = dma.done.wait (%p5237_p3), [#allocation3], 12288   ;;  %p5238_p7 = pmov %p5237_p3 }
  0x6e   : > { %p5239_p11 = pmov %p5237_p3 }
  0x6f   : > { %4555 = vsyncadd (%p5238_p7), [#allocation3], 4294955008 }
  0x70   : > { %4557 = dma.done.wait (%p5239_p11), [#allocation5], 16384   ;;  %p5240_p12 = pmov %p5237_p3 }
  0x71   : > { %p5241_p13 = pmov %p5237_p3 }
  0x72   : > { %4559 = vsyncadd (%p5240_p12), [#allocation5], 4294950912 }
  0x73   : > { %4561 = dma.done.wait (%p5241_p13), [#allocation8], 4096   ;;  %p5242_p5 = pmov %p5237_p3 }
  0x74   : > { %v4578_v0 = vmov 0.0   ;;  %v4579_v1 = vmov 0.0|0.0   ;;  %v430_v2 = vld [vmem:[#allocation2 + $0x8] sm:$0xff]  ;;  %v433_v3 = vld [vmem:[#allocation2 + $0x20] sm:$0xff]  ;;  %v432_v6 = vld [vmem:[#allocation2 + $0x18] sm:$0xff]  ;;  %p416_p0 = scmp.lt.s32.totalorder %s4645_s16, 1 }
  0x75   : > { %4563 = vsyncadd (%p5242_p5), [#allocation8], 4294963200  ;;  %541 = vmatprep.mubr.f32.mxu0 %v4578_v0  ;;  %4013 = vmatprep.subr.bf16.mxu1 %v4579_v1  ;;  %v429_v4 = vld [vmem:[#allocation2] sm:$0xff]  ;;  %v3981_v5 = vpack.c.bf16 %v433_v3, %v430_v2  ;;  %v436_v7 = vld [vmem:[#allocation2 + $0x38] sm:$0xff]  ;;  %vm4580_vm0 = vmmov 0   ;;  %vm640_vm1 = vcmask 261120  }
  0x76   : > { %v439_v8 = vld [vmem:[#allocation2 + $0x50] sm:$0xff]  ;;  %v3983_v9 = vpack.c.bf16 %v432_v6, %v429_v4  ;;  %v438_v12 = vld [vmem:[#allocation2 + $0x48] sm:$0xff]  ;;  %v445_v14 = vld [vmem:[#allocation2 + $0x80] sm:$0xff]  ;;  %s5244_s16 = smov (!%p416_p0, %s4645_s16), 1  ;;  %3713 = vmatprep.mubr.msk.f32.mxu1 %vm4580_vm0, %v4578_v0  ;;  %s4581_s14 = smov 64   ;;  %vm951_vm2 = vcmask 64512  }
  0x77   : > { %v3985_v10 = vpack.c.bf16 %v439_v8, %v436_v7  ;;  %v435_v11 = vld [vmem:[#allocation2 + $0x30] sm:$0xff]  ;;  %v442_v13 = vld [vmem:[#allocation2 + $0x68] sm:$0xff]  ;;  %3982 = vmatprep.subr.bf16.mxu0 %v3981_v5  ;;  %v441_v17 = vld [vmem:[#allocation2 + $0x60] sm:$0xff]  ;;  %s3424_s17 = sshll.u32 %s5244_s16, 3  ;;  %s4582_s18 = smov 96   ;;  %vm1311_vm3 = vcmask 523264  }
  0x78   : > { %3984 = vmatpush1.bf16.msra.mxu0 %v3983_v9  ;;  %v3987_v15 = vpack.c.bf16 %v438_v12, %v435_v11  ;;  %v3989_v16 = vpack.c.bf16 %v445_v14, %v442_v13  ;;  %v444_v18 = vld [vmem:[#allocation2 + $0x78] sm:$0xff]  ;;  %v451_v20 = vld [vmem:[#allocation2 + $0xb0] sm:$0xff]  ;;  %v450_v24 = vld [vmem:[#allocation2 + $0xa8] sm:$0xff]  ;;  %s419_s19 = scalar_lea.vmem %s5220_s0, %s3424_s17  ;;  %v618_v13 = vlaneseq  ;;  %s4583_s21 = smov 32   ;;  %vm1313_vm4 = vcmask 785408  }
  0x79   : > { %3986 = vmatprep.subr.bf16.mxu0 %v3985_v10  ;;  %v448_v19 = vld [vmem:[#allocation2 + $0x98] sm:$0xff]  ;;  %v3991_v21 = vpack.c.bf16 %v444_v18, %v441_v17  ;;  %v447_v23 = vld [vmem:[#allocation2 + $0x90] sm:$0xff]  ;;  %v454_v25 = vld [vmem:[#allocation2 + $0xc8] sm:$0xff]  ;;  %s4854_s25 = scalar_lea.vmem %s5221_s1, %s5244_s16  ;;  %vm3132_vm6 = vcmask 57344   ;;  %vm3218_vm7 = vcmask 1040384   ;;  %s425_s30 = scalar_lea.vmem %s5230_s10, %s5244_s16 }
  0x7a   : > { %v3993_v22 = vpack.c.bf16 %v451_v20, %v448_v19  ;;  %v457_v26 = vld [vmem:[#allocation2 + $0xe0] sm:$0xff]  ;;  %v431_v27 = vld [vmem:[#allocation2 + $0x10] sm:$0xff]  ;;  %v434_v28 = vld [vmem:[#allocation2 + $0x28] sm:$0xff]  ;;  %v3995_v29 = vpack.c.bf16 %v450_v24, %v447_v23  ;;  %v4802_v14 = vshrl.u32 %v618_v13, 7 }
  0x7b   : > { %v4014_v30 = vpack.c.bf16 %v434_v28, %v431_v27  ;;  %v437_v31 = vld [vmem:[#allocation2 + $0x40] sm:$0xff]  ;;  %v440_v32 = vld [vmem:[#allocation2 + $0x58] sm:$0xff]  ;;  %v3997_v33 = vpack.c.bf16 %v457_v26, %v454_v25  ;;  %v463_v37 = vld [vmem:[#allocation2 + $0x110] sm:$0xff] }
  0x7c   : > { %3988 = vmatpush1.bf16.msra.mxu0 %v3987_v15  ;;  %v453_v34 = vld [vmem:[#allocation2 + $0xc0] sm:$0xff]  ;;  %v456_v35 = vld [vmem:[#allocation2 + $0xd8] sm:$0xff]  ;;  %v4017_v38 = vpack.c.bf16 %v440_v32, %v437_v31  ;;  %v443_v39 = vld [vmem:[#allocation2 + $0x70] sm:$0xff]  ;;  %v4805_v15 = vsub.s32 1, %v4802_v14  ;;  %v4813_v17 = vsub.s32 0, %v4802_v14  ;;  %v630_v28 = vsub.s32 2, %v4802_v14 }
  0x7d   : > { %3990 = vmatprep.subr.bf16.mxu0 %v3989_v16  ;;  %v460_v36 = vld [vmem:[#allocation2 + $0xf8] sm:$0xff]  ;;  %4015 = vmatpush3.bf16.msra.mxu1 %v4014_v30  ;;  %v446_v40 = vld [vmem:[#allocation2 + $0x88] sm:$0xff]  ;;  %v3999_v41 = vpack.c.bf16 %v456_v35, %v453_v34  ;;  %v459_v43 = vld [vmem:[#allocation2 + $0xf0] sm:$0xff] }
  0x7e   : > { %4016 = vmatprep.subr.bf16.mxu1 %v4579_v1  ;;  %v4001_v42 = vpack.c.bf16 %v463_v37, %v460_v36  ;;  %v462_v44 = vld [vmem:[#allocation2 + $0x108] sm:$0xff]  ;;  %v469_v46 = vld [vmem:[#allocation2 + $0x140] sm:$0xff]  ;;  %v4020_v47 = vpack.c.bf16 %v446_v40, %v443_v39  ;;  %v452_v49 = vld [vmem:[#allocation2 + $0xb8] sm:$0xff] }
  0x7f   : > { %v466_v45 = vld [vmem:[#allocation2 + $0x128] sm:$0xff]  ;;  %v449_v48 = vld [vmem:[#allocation2 + $0xa0] sm:$0xff]  ;;  %v4003_v50 = vpack.c.bf16 %v462_v44, %v459_v43  ;;  %v468_v53 = vld [vmem:[#allocation2 + $0x138] sm:$0xff] }
  0x80   : > { %3992 = vmatpush1.bf16.msra.mxu0 %v3991_v21  ;;  %v4005_v51 = vpack.c.bf16 %v469_v46, %v466_v45  ;;  %v465_v52 = vld [vmem:[#allocation2 + $0x120] sm:$0xff]  ;;  %v472_v54 = vld [vmem:[#allocation2 + $0x158] sm:$0xff]  ;;  %v475_v55 = vld [vmem:[#allocation2 + $0x170] sm:$0xff]  ;;  %v4023_v56 = vpack.c.bf16 %v452_v49, %v449_v48 }
  0x81   : > { %3994 = vmatprep.subr.bf16.mxu0 %v3993_v22  ;;  %4018 = vmatpush3.bf16.msra.mxu1 %v4017_v38  ;;  %v455_v57 = vld [vmem:[#allocation2 + $0xd0] sm:$0xff]  ;;  %v458_v58 = vld [vmem:[#allocation2 + $0xe8] sm:$0xff]  ;;  %v4007_v59 = vpack.c.bf16 %v468_v53, %v465_v52  ;;  %v4009_v60 = vpack.c.bf16 %v475_v55, %v472_v54  ;;  %v461_v2 = vld [vmem:[#allocation2 + $0x100] sm:$0xff] }
  0x82   : > { %4019 = vmatprep.subr.bf16.mxu1 %v4579_v1  ;;  %v471_v61 = vld [vmem:[#allocation2 + $0x150] sm:$0xff]  ;;  %v474_v62 = vld [vmem:[#allocation2 + $0x168] sm:$0xff]  ;;  %v4026_v63 = vpack.c.bf16 %v458_v58, %v455_v57  ;;  %v464_v3 = vld [vmem:[#allocation2 + $0x118] sm:$0xff] }
  0x83   : > { %v4011_v4 = vpack.c.bf16 %v474_v62, %v471_v61  ;;  %v4029_v5 = vpack.c.bf16 %v464_v3, %v461_v2  ;;  %v467_v6 = vld [vmem:[#allocation2 + $0x130] sm:$0xff]  ;;  %v470_v7 = vld [vmem:[#allocation2 + $0x148] sm:$0xff]  ;;  %v4788_v8 = vld [vmem:[%s419_s19] sm:$0xff] }
  0x84   : > { %3996 = vmatpush1.bf16.msra.mxu0 %v3995_v29  ;;  %v4032_v9 = vpack.c.bf16 %v470_v7, %v467_v6  ;;  %v473_v10 = vld [vmem:[#allocation2 + $0x160] sm:$0xff]  ;;  %v476_v11 = vld [vmem:[#allocation2 + $0x178] sm:$0xff] }
  0x85   : > { %3998 = vmatprep.subr.bf16.mxu0 %v3997_v33  ;;  %4021 = vmatpush3.bf16.msra.mxu1 %v4020_v47  ;;  %v4035_v12 = vpack.c.bf16 %v476_v11, %v473_v10  ;;  %v4810_v16 = vld [vmem:[%s5227_s7] sm:$0xff] }
  0x86   : > { %4022 = vmatprep.subr.bf16.mxu1 %v4579_v1  ;;  %v626_v18 = vrot.slane %v4810_v16, %v4805_v15  ;;  %v621_v21 = vrot.slane %v4810_v16, %v4813_v17  ;;  %v631_v31 = vrot.slane %v4810_v16, %v630_v28  ;;  %v4857_v35 = vld [vmem:[%s4854_s25] ss:$0 sm:$0xff] }
  0x88   : > { %4000 = vmatpush1.bf16.msra.mxu0 %v3999_v41 }
  0x89   : > { %4002 = vmatprep.subr.bf16.mxu0 %v4001_v42  ;;  %4024 = vmatpush3.bf16.msra.mxu1 %v4023_v56 }
  0x8a   : > { %4025 = vmatprep.subr.bf16.mxu1 %v4579_v1 }
  0x8c   : > { %4004 = vmatpush1.bf16.msra.mxu0 %v4003_v50 }
  0x8d   : > { %4006 = vmatprep.subr.bf16.mxu0 %v4005_v51  ;;  %4027 = vmatpush3.bf16.msra.mxu1 %v4026_v63 }
  0x8e   : > { %4028 = vmatprep.subr.bf16.mxu1 %v4579_v1 }
  0x90   : > { %4008 = vmatpush1.bf16.msra.mxu0 %v4007_v59 }
  0x91   : > { %4010 = vmatprep.subr.bf16.mxu0 %v4009_v60  ;;  %4030 = vmatpush3.bf16.msra.mxu1 %v4029_v5 }
  0x92   : > { %4031 = vmatprep.subr.bf16.mxu1 %v4579_v1 }
  0x94   : > { %4012 = vmatpush1.bf16.msra.mxu0 %v4011_v4 }
  0x95   : > { %4037 = vmatprep.subr.bf16.mxu0 %v4579_v1  ;;  %4033 = vmatpush3.bf16.msra.mxu1 %v4032_v9 }
  0x96   : > { %4034 = vmatprep.subr.bf16.mxu1 %v4579_v1 }
  0x97   : > { %542 = vmatmul.mubr.f32.vlgmr.msra.gmra.mrb[0].mxu0 %v4788_v8 }
  0x98   : > { %3788 = vmatprep.mubr.msk.f32.mxu0 %vm4580_vm0, %v4578_v0 }
  0x99   : > { %4036 = vmatpush3.bf16.msra.mxu1 %v4035_v12 }
  0x9a   : > { %3716 = vmatprep.subr.mxu1 %v4578_v0 }
  0x9c   : > { %3714 = vmatmul.mubr.f32.vlgmr.msra.gmra.mrb[0].mxu1 %v4788_v8 }
  0x9d   : > { %3718 = vmatprep.mubr.msk.f32.mxu1 %vm4580_vm0, %v4578_v0 }
 0x16a   : > { %v543_v19 = vpop.f32.mrb[0].mxu0 }
 0x16b   : > { %v545_v20 = vpop.f32.mrb[1].mxu0  ;;  %v622_v23 = vadd.f32 %v621_v21, %v543_v19 }
 0x16c   : > { %v627_v22 = vadd.f32 %v626_v18, %v545_v20 }
 0x16e   : > { %797 = vrot.lane.b32.xlu1 %v627_v22, %s4581_s14  ;;  %719 = vrot.lane.b32.xlu0 %v627_v22, %s4582_s18 }
 0x16f   : > { %3717 = vmatpush3.xpose.msk.msra.mxu1 %vm640_vm1, %v627_v22  ;;  %v614_v24 = vpop.f32.mrb[0].mxu1 }
 0x170   : > { %3721 = vmatprep.subr.mxu1 %v4578_v0  ;;  %v3715_v25 = vpop.f32.mrb[1].mxu1  ;;  %v632_v33 = vadd.f32 %v631_v31, %v614_v24  ;;  %v1315_v31 = vld [vmem:[%s5223_s3] sm:$0xff] }
 0x172   : > { %3719 = vmatmul.mubr.msk.f32.vlgmr.msra.gmra.mrb[2].mxu1 %vm640_vm1, %v622_v23  ;;  %795 = vrot.lane.b32.xlu1 %v622_v23, %s4581_s14 }
 0x173   : > { %717 = vrot.lane.b32.xlu0 %v622_v23, %s4582_s18  ;;  %3723 = vmatprep.mubr.msk.f32.mxu1 %vm4580_vm0, %v4578_v0 }
 0x176   : > { %873 = vrot.lane.b32.xlu1 %v622_v23, %s4583_s21 }
 0x177   : > { %875 = vrot.lane.b32.xlu0 %v627_v22, %s4583_s21 }
 0x1e0   : > { %v720_v26 = vpop.permute.xlu0 %719  ;;  %v798_v27 = vpop.permute.xlu1 %797 }
 0x1e1   : > { %3722 = vmatpush3.xpose.msk.msra.mxu1 %vm640_vm1, %v720_v26 }
 0x1e2   : > { %3726 = vmatprep.subr.mxu1 %v4578_v0 }
 0x1e4   : > { %v796_v30 = vpop.permute.xlu1 %795 }
 0x1e5   : > { %v718_v29 = vpop.permute.xlu0 %717 }
 0x1e6   : > { %3724 = vmatmul.mubr.msk.f32.vlgmr.msra.gmra.mrb[4].mxu1 %vm640_vm1, %v718_v29 }
 0x1e7   : > { %3727 = vmatpush3.xpose.msk.msra.mxu1 %vm640_vm1, %v798_v27  ;;  %3728 = vmatprep.mubr.msk.f32.mxu1 %vm4580_vm0, %v4578_v0 }
 0x1e8   : > { %3731 = vmatprep.subr.mxu1 %v4578_v0  ;;  %v874_v34 = vpop.permute.xlu1 %873 }
 0x1e9   : > { %v876_v32 = vpop.permute.xlu0 %875 }
 0x1ea   : > { %3729 = vmatmul.mubr.msk.f32.vlgmr.msra.gmra.mrb[6].mxu1 %vm640_vm1, %v796_v30 }
 0x1eb   : > { %3732 = vmatpush3.xpose.msk.msra.mxu1 %vm640_vm1, %v876_v32  ;;  %3733 = vmatprep.mubr.msk.f32.mxu1 %vm4580_vm0, %v4578_v0  ;;  %v1316_v32 = vld [vmem:[%s5223_s3 + $0x8] sm:$0xff] }
 0x1ec   : > { %3736 = vmatprep.subr.mxu1 %v4578_v0 }
 0x1ee   : > { %3734 = vmatmul.mubr.msk.f32.vlgmr.msra.gmra.mrb[8].mxu1 %vm640_vm1, %v874_v34  ;;  %v4038_v34 = vpack.c.bf16 %v1316_v32, %v1315_v31 }
 0x1ef   : > { %3737 = vmatpush3.msra.mxu1 %v632_v33  ;;  %3738 = vmatprep.mubr.msk.f32.mxu1 %vm4580_vm0, %v4578_v0 }
 0x1f0   : > { %3741 = vmatprep.subr.mxu1 %v4578_v0  ;;  %4039 = vmatpush3.bf16.msra.mxu0 %v4038_v34  ;;  %v1441_v34 = vld [vmem:[#allocation4 + $0x58] sm:$0xff] }
 0x1f1   : > { %4040 = vmatprep.subr.bf16.mxu0 %v4579_v1 }
 0x245   : > { %v713_v36 = vpop.f32.mrb[2].mxu1 }
 0x246   : > { %v714_v37 = vadd.f32 %v4857_v35, %v713_v36  ;;  %v3720_v38 = vpop.f32.mrb[3].mxu1  ;;  %v1318_v36 = vld [vmem:[%s5223_s3 + $0x18] sm:$0xff] }
 0x247   : > { %v1319_v38 = vld [vmem:[%s5223_s3 + $0x20] sm:$0xff] }
 0x248   : > { %v952_v39 = vsel %vm951_vm2, %v714_v37, -inf }
 0x249   : > { %953 = vmax.xlane.f32.xlu0 %v952_v39  ;;  %v1320_v39 = vld [vmem:[%s5223_s3 + $0x28] sm:$0xff] }
 0x2b9   : > { %v791_v40 = vpop.f32.mrb[4].mxu1 }
 0x2ba   : > { %v792_v41 = vadd.f32 %v4857_v35, %v791_v40  ;;  %v3725_v42 = vpop.f32.mrb[5].mxu1  ;;  %v4044_v40 = vpack.c.bf16 %v1320_v39, %v1319_v38  ;;  %v1440_v38 = vld [vmem:[#allocation4 + $0x50] sm:$0xff] }
 0x2bb   : > { %v1322_v42 = vld [vmem:[%s5223_s3 + $0x38] sm:$0xff] }
 0x2bc   : > { %v955_v43 = vsel %vm951_vm2, %v792_v41, -inf }
 0x2bd   : > { %956 = vmax.xlane.f32.xlu1 %v955_v43  ;;  %v869_v44 = vpop.f32.mrb[6].mxu1 }
 0x2be   : > { %v870_v45 = vadd.f32 %v4857_v35, %v869_v44  ;;  %v3730_v46 = vpop.f32.mrb[7].mxu1  ;;  %v1323_v44 = vld [vmem:[%s5223_s3 + $0x40] sm:$0xff] }
 0x2c0   : > { %v958_v47 = vsel %vm951_vm2, %v870_v45, -inf }
 0x2c1   : > { %959 = vmax.xlane.f32.xlu0 %v958_v47  ;;  %v947_v48 = vpop.f32.mrb[8].mxu1 }
 0x2c2   : > { %v948_v49 = vadd.f32 %v4857_v35, %v947_v48  ;;  %v3735_v50 = vpop.f32.mrb[9].mxu1 }
 0x2c3   : > { %v1326_v50 = vld [vmem:[%s5223_s3 + $0x58] sm:$0xff] }
 0x2c4   : > { %v961_v51 = vsel %vm951_vm2, %v948_v49, -inf }
 0x2c5   : > { %962 = vmax.xlane.f32.xlu0 %v961_v51 }
 0x2ce   : > { %1070 = vrot.lane.b32.xlu1 %v632_v33, %s4582_s18 }
 0x2d6   : > { %v954_v52 = vpop.xlane.xlu0 %953 }
 0x2d7   : > { %v964_v53 = vsub.f32 %v714_v37, %v954_v52  ;;  %v1327_v52 = vld [vmem:[%s5223_s3 + $0x60] sm:$0xff] }
 0x2d9   : > { %v968_v54 = vmul.f32 1.442695, %v964_v53  ;;  %v1328_v53 = vld [vmem:[%s5223_s3 + $0x68] sm:$0xff] }
 0x2db   : > { %4378 = vpow2.f32 %v968_v54  ;;  %v4056_v54 = vpack.c.bf16 %v1328_v53, %v1327_v52  ;;  %v1453_v52 = vld [vmem:[#allocation4 + $0xb8] sm:$0xff]  ;;  %v1450_v53 = vld [vmem:[#allocation4 + $0xa0] sm:$0xff] }
 0x2e5   : > { %v4379_v55 = vpop.eup %4378 }
 0x2e6   : > { %v976_v56 = vsel %vm951_vm2, %v4379_v55, 0.0 }
 0x2f2   : > { %977 = vadd.xlane.f32.xlu1 %v976_v56  ;;  %v1330_v56 = vld [vmem:[%s5223_s3 + $0x78] sm:$0xff] }
 0x34a   : > { %v957_v57 = vpop.xlane.xlu1 %956 }
 0x34b   : > { %v965_v58 = vsub.f32 %v792_v41, %v957_v57  ;;  %v1321_v41 = vld [vmem:[%s5223_s3 + $0x30] sm:$0xff] }
 0x34c   : > { %v4047_v43 = vpack.c.bf16 %v1322_v42, %v1321_v41  ;;  %v1445_v41 = vld [vmem:[#allocation4 + $0x78] sm:$0xff] }
 0x34d   : > { %v970_v59 = vmul.f32 1.442695, %v965_v58 }
 0x34e   : > { %v960_v60 = vpop.xlane.xlu0 %959  ;;  %v1071_v11 = vpop.permute.xlu1 %1070 }
 0x34f   : > { %4380 = vpow2.f32 %v970_v59  ;;  %v966_v61 = vsub.f32 %v870_v45, %v960_v60  ;;  %v1324_v45 = vld [vmem:[%s5223_s3 + $0x48] sm:$0xff] }
 0x350   : > { %v4050_v48 = vpack.c.bf16 %v1324_v45, %v1323_v44  ;;  %v1447_v45 = vld [vmem:[#allocation4 + $0x88] sm:$0xff] }
 0x351   : > { %v972_v62 = vmul.f32 1.442695, %v966_v61 }
 0x352   : > { %v963_v63 = vpop.xlane.xlu0 %962 }
 0x353   : > { %4382 = vpow2.f32 %v972_v62  ;;  %v967_v2 = vsub.f32 %v948_v49, %v963_v63  ;;  %v1325_v49 = vld [vmem:[%s5223_s3 + $0x50] sm:$0xff] }
 0x354   : > { %v4053_v51 = vpack.c.bf16 %v1326_v50, %v1325_v49  ;;  %v1448_v49 = vld [vmem:[#allocation4 + $0x90] sm:$0xff]  ;;  %v1451_v50 = vld [vmem:[#allocation4 + $0xa8] sm:$0xff] }
 0x355   : > { %v974_v3 = vmul.f32 1.442695, %v967_v2 }
 0x357   : > { %4384 = vpow2.f32 %v974_v3 }
 0x359   : > { %v4381_v4 = vpop.eup %4380 }
 0x35a   : > { %v979_v5 = vsel %vm951_vm2, %v4381_v4, 0.0 }
 0x35b   : > { %980 = vadd.xlane.f32.xlu0 %v979_v5 }
 0x35d   : > { %v4383_v6 = vpop.eup %4382 }
 0x35e   : > { %v982_v7 = vsel %vm951_vm2, %v4383_v6, 0.0 }
 0x35f   : > { %983 = vadd.xlane.f32.xlu1 %v982_v7 }
 0x361   : > { %v4385_v9 = vpop.eup %4384 }
 0x362   : > { %v985_v10 = vsel %vm951_vm2, %v4385_v9, 0.0 }
 0x363   : > { %986 = vadd.xlane.f32.xlu0 %v985_v10  ;;  %v1433_v10 = vld [vmem:[#allocation4 + $0x18] sm:$0xff] }
 0x370   : > { %1222 = vrot.lane.b32.xlu1 %v632_v33, %s4583_s21 }
 0x379   : > { %1146 = vrot.lane.b32.xlu0 %v632_v33, %s4581_s14  ;;  %v1317_v33 = vld [vmem:[%s5223_s3 + $0x10] sm:$0xff] }
 0x37a   : > { %v4041_v37 = vpack.c.bf16 %v1318_v36, %v1317_v33  ;;  %v1439_v33 = vld [vmem:[#allocation4 + $0x48] sm:$0xff] }
 0x37b   : > { %v4069_v36 = vpack.c.bf16 %v1441_v34, %v1439_v33 }
 0x37c   : > { %4042 = vmatpush3.bf16.msra.mxu0 %v4041_v37  ;;  %v1438_v37 = vld [vmem:[#allocation4 + $0x40] sm:$0xff] }
 0x37d   : > { %4043 = vmatprep.subr.bf16.mxu0 %v4579_v1  ;;  %v4071_v39 = vpack.c.bf16 %v1440_v38, %v1438_v37  ;;  %v1581_v38 = vld [vmem:[#allocation6 + $0x90] sm:$0xff] }
 0x37f   : > { %v978_v12 = vpop.xlane.xlu1 %977 }
 0x380   : > { %4386 = vrcp.f32 %v978_v12  ;;  %4045 = vmatpush3.bf16.msra.mxu0 %v4044_v40  ;;  %v1443_v40 = vld [vmem:[#allocation4 + $0x68] sm:$0xff] }
 0x381   : > { %4046 = vmatprep.subr.bf16.mxu0 %v4579_v1  ;;  %v4073_v42 = vpack.c.bf16 %v1445_v41, %v1443_v40  ;;  %v1565_v40 = vld [vmem:[#allocation6 + $0x10] sm:$0xff]  ;;  %v1566_v41 = vld [vmem:[#allocation6 + $0x18] sm:$0xff] }
 0x384   : > { %4048 = vmatpush3.bf16.msra.mxu0 %v4047_v43  ;;  %v1442_v43 = vld [vmem:[#allocation4 + $0x60] sm:$0xff] }
 0x385   : > { %4049 = vmatprep.subr.bf16.mxu0 %v4579_v1 }
 0x388   : > { %4051 = vmatpush3.bf16.msra.mxu0 %v4050_v48  ;;  %v1446_v48 = vld [vmem:[#allocation4 + $0x80] sm:$0xff] }
 0x389   : > { %4052 = vmatprep.subr.bf16.mxu0 %v4579_v1 }
 0x38a   : > { %v4387_v13 = vpop.eup %4386 }
 0x38b   : > { %v992_v18 = vmul.f32 %v4387_v13, %v4379_v55  ;;  %v1329_v55 = vld [vmem:[%s5223_s3 + $0x70] sm:$0xff] }
 0x38c   : > { %4054 = vmatpush3.bf16.msra.mxu0 %v4053_v51  ;;  %v4059_v57 = vpack.c.bf16 %v1330_v56, %v1329_v55  ;;  %v1432_v13 = vld [vmem:[#allocation4 + $0x10] sm:$0xff]  ;;  %v4079_v51 = vpack.c.bf16 %v1448_v49, %v1446_v48  ;;  %v4081_v55 = vpack.c.bf16 %v1453_v52, %v1451_v50  ;;  %v1455_v56 = vld [vmem:[#allocation4 + $0xc8] sm:$0xff]  ;;  %v1586_v49 = vld [vmem:[#allocation6 + $0xb8] sm:$0xff] }
 0x38d   : > { %3739 = vmatmul.mubr.msk.f32.vlgmr.msra.gmra.mrb[10].mxu1 %vm951_vm2, %v992_v18  ;;  %4055 = vmatprep.subr.bf16.mxu0 %v4579_v1  ;;  %v1435_v18 = vld [vmem:[#allocation4 + $0x28] sm:$0xff]  ;;  %v1585_v48 = vld [vmem:[#allocation6 + $0xb0] sm:$0xff]  ;;  %v1570_v52 = vld [vmem:[#allocation6 + $0x38] sm:$0xff] }
 0x38e   : > { %3742 = vmatpush3.msra.mxu1 %v1071_v11  ;;  %3743 = vmatprep.mubr.msk.f32.mxu1 %vm4580_vm0, %v4578_v0  ;;  %v1430_v11 = vld [vmem:[#allocation4] sm:$0xff]  ;;  %v4105_v50 = vpack.c.bf16 %v1586_v49, %v1585_v48 }
 0x38f   : > { %3746 = vmatprep.subr.mxu1 %v4578_v0 }
 0x390   : > { %4057 = vmatpush3.bf16.msra.mxu0 %v4056_v54  ;;  %v1452_v54 = vld [vmem:[#allocation4 + $0xb0] sm:$0xff] }
 0x391   : > { %4058 = vmatprep.subr.bf16.mxu0 %v4579_v1 }
 0x394   : > { %4060 = vmatpush3.bf16.msra.mxu0 %v4059_v57  ;;  %v1457_v57 = vld [vmem:[#allocation4 + $0xd8] sm:$0xff] }
 0x3e8   : > { %v981_v19 = vpop.xlane.xlu0 %980 }
 0x3e9   : > { %4388 = vrcp.f32 %v981_v19  ;;  %v1437_v19 = vld [vmem:[#allocation4 + $0x38] sm:$0xff] }
 0x3ec   : > { %v984_v20 = vpop.xlane.xlu1 %983 }
 0x3ed   : > { %4390 = vrcp.f32 %v984_v20  ;;  %v4063_v20 = vpack.c.bf16 %v1432_v13, %v1430_v11 }
 0x3f0   : > { %v987_v21 = vpop.xlane.xlu0 %986  ;;  %v1223_v27 = vpop.permute.xlu1 %1222 }
 0x3f1   : > { %4392 = vrcp.f32 %v987_v21  ;;  %v4065_v21 = vpack.c.bf16 %v1437_v19, %v1435_v18 }
 0x3f3   : > { %v4389_v22 = vpop.eup %4388 }
 0x3f4   : > { %v993_v23 = vmul.f32 %v4389_v22, %v4381_v4  ;;  %v1147_v24 = vpop.permute.xlu0 %1146  ;;  %v1434_v22 = vld [vmem:[#allocation4 + $0x20] sm:$0xff] }
 0x3f6   : > { %3744 = vmatmul.mubr.msk.f32.vlgmr.msra.gmra.mrb[12].mxu1 %vm951_vm2, %v993_v23  ;;  %v1436_v23 = vld [vmem:[#allocation4 + $0x30] sm:$0xff] }
 0x3f7   : > { %v4391_v25 = vpop.eup %4390  ;;  %3747 = vmatpush3.msra.mxu1 %v1147_v24  ;;  %3748 = vmatprep.mubr.msk.f32.mxu1 %vm4580_vm0, %v4578_v0  ;;  %v4067_v24 = vpack.c.bf16 %v1436_v23, %v1434_v22 }
 0x3f8   : > { %v994_v26 = vmul.f32 %v4391_v25, %v4383_v6  ;;  %3751 = vmatprep.subr.mxu1 %v4578_v0  ;;  %v1333_v25 = vsub.s32 3, %v4802_v14 }
 0x3fa   : > { %3749 = vmatmul.mubr.msk.f32.vlgmr.msra.gmra.mrb[14].mxu1 %vm951_vm2, %v994_v26  ;;  %v1334_v26 = vrot.slane %v4810_v16, %v1333_v25 }
 0x3fb   : > { %v4393_v29 = vpop.eup %4392  ;;  %3752 = vmatpush3.msra.mxu1 %v1223_v27  ;;  %3753 = vmatprep.mubr.msk.f32.mxu1 %vm4580_vm0, %v4578_v0 }
 0x3fc   : > { %v995_v30 = vmul.f32 %v4393_v29, %v4385_v9  ;;  %v1431_v9 = vld [vmem:[#allocation4 + $0x8] sm:$0xff] }
 0x3fd   : > { %v4061_v12 = vpack.c.bf16 %v1433_v10, %v1431_v9  ;;  %v1580_v9 = vld [vmem:[#allocation6 + $0x88] sm:$0xff]  ;;  %v1563_v10 = vld [vmem:[#allocation6] sm:$0xff] }
 0x3fe   : > { %3754 = vmatmul.mubr.msk.f32.vlgmr.msra.gmra.mrb[16].mxu1 %vm951_vm2, %v995_v30 }
 0x3ff   : > { %1538 = vmatprep.mubr.f32.mxu1 %v4578_v0  ;;  %4062 = vmatprep.subr.bf16.mxu1 %v4061_v12  ;;  %v1564_v12 = vld [vmem:[#allocation6 + $0x8] sm:$0xff] }
 0x400   : > { %4064 = vmatpush1.bf16.msra.mxu1 %v4063_v20  ;;  %v4095_v13 = vpack.c.bf16 %v1564_v12, %v1563_v10  ;;  %v1593_v10 = vld [vmem:[#allocation6 + $0xf0] sm:$0xff] }
 0x401   : > { %4066 = vmatprep.subr.bf16.mxu1 %v4065_v21 }
 0x404   : > { %4068 = vmatpush1.bf16.msra.mxu1 %v4067_v24 }
 0x405   : > { %4070 = vmatprep.subr.bf16.mxu1 %v4069_v36 }
 0x408   : > { %4072 = vmatpush1.bf16.msra.mxu1 %v4071_v39  ;;  %v1582_v39 = vld [vmem:[#allocation6 + $0x98] sm:$0xff] }
 0x409   : > { %4074 = vmatprep.subr.bf16.mxu1 %v4073_v42  ;;  %v4099_v42 = vpack.c.bf16 %v1566_v41, %v1565_v40 }
 0x460   : > { %v1065_v46 = vpop.f32.mrb[10].mxu1 }
 0x461   : > { %v3740_v47 = vpop.f32.mrb[11].mxu1 }
 0x4c9   : > { %v1142_v58 = vpop.f32.mrb[12].mxu1 }
 0x4ca   : > { %1299 = vrot.lane.b32.xlu1 %v1142_v58, %s4583_s21  ;;  %v3745_v59 = vpop.f32.mrb[13].mxu1  ;;  %v4083_v58 = vpack.c.bf16 %v1452_v54, %v1450_v53  ;;  %v1587_v53 = vld [vmem:[#allocation6 + $0xc0] sm:$0xff] }
 0x4cb   : > { %v4085_v59 = vpack.c.bf16 %v1457_v57, %v1455_v56  ;;  %v1571_v56 = vld [vmem:[#allocation6 + $0x40] sm:$0xff]  ;;  %v1572_v57 = vld [vmem:[#allocation6 + $0x48] sm:$0xff] }
 0x4cd   : > { %v1218_v60 = vpop.f32.mrb[14].mxu1 }
 0x4ce   : > { %1303 = vrot.lane.b32.xlu0 %v1218_v60, %s4581_s14  ;;  %v3750_v61 = vpop.f32.mrb[15].mxu1  ;;  %v1454_v60 = vld [vmem:[#allocation4 + $0xc0] sm:$0xff] }
 0x4cf   : > { %v1456_v61 = vld [vmem:[#allocation4 + $0xd0] sm:$0xff] }
 0x4d1   : > { %v1294_v62 = vpop.f32.mrb[16].mxu1 }
 0x4d2   : > { %1307 = vrot.lane.b32.xlu1 %v1294_v62, %s4582_s18  ;;  %v3755_v63 = vpop.f32.mrb[17].mxu1  ;;  %v1459_v62 = vld [vmem:[#allocation4 + $0xe8] sm:$0xff] }
 0x4d3   : > { %v1461_v63 = vld [vmem:[#allocation4 + $0xf8] sm:$0xff] }
 0x53c   : > { %v1300_v2 = vpop.permute.xlu1 %1299 }
 0x53d   : > { %v1310_v4 = vsel %vm640_vm1, %v1065_v46, %v1300_v2  ;;  %v1449_v46 = vld [vmem:[#allocation4 + $0x98] sm:$0xff]  ;;  %v4087_v2 = vpack.c.bf16 %v1456_v61, %v1454_v60  ;;  %v4111_v61 = vpack.c.bf16 %v1572_v57, %v1571_v56  ;;  %v1700_v56 = vld [vmem:[#allocation2 + $0x190] sm:$0xff]  ;;  %v1703_v57 = vld [vmem:[#allocation2 + $0x1a8] sm:$0xff] }
 0x53e   : > { %v4077_v47 = vpack.c.bf16 %v1449_v46, %v1447_v45  ;;  %v1567_v45 = vld [vmem:[#allocation6 + $0x20] sm:$0xff]  ;;  %v1568_v46 = vld [vmem:[#allocation6 + $0x28] sm:$0xff]  ;;  %v1590_v60 = vld [vmem:[#allocation6 + $0xd8] sm:$0xff] }
 0x540   : > { %v1304_v3 = vpop.permute.xlu0 %1303 }
 0x541   : > { %v1312_v5 = vsel %vm1311_vm3, %v1310_v4, %v1304_v3  ;;  %v4089_v3 = vpack.c.bf16 %v1461_v63, %v1459_v62  ;;  %v1458_v4 = vld [vmem:[#allocation4 + $0xe0] sm:$0xff]  ;;  %v1573_v63 = vld [vmem:[#allocation6 + $0x50] sm:$0xff] }
 0x544   : > { %v1308_v6 = vpop.permute.xlu1 %1307 }
 0x545   : > { %v1314_v7 = vsel %vm1313_vm4, %v1312_v5, %v1308_v6  ;;  %v1460_v5 = vld [vmem:[#allocation4 + $0xf0] sm:$0xff] }
 0x546   : > { %3789 = vmatmul.mubr.f32.vlgmr.msra.gmra.mrb[2].mxu0 %v1314_v7  ;;  %v4091_v6 = vpack.c.bf16 %v1460_v5, %v1458_v4  ;;  %v1579_v7 = vld [vmem:[#allocation6 + $0x80] sm:$0xff]  ;;  %v1592_v4 = vld [vmem:[#allocation6 + $0xe8] sm:$0xff] }
 0x547   : > { %v4093_v11 = vpack.c.bf16 %v1580_v9, %v1579_v7  ;;  %v1575_v7 = vld [vmem:[#allocation6 + $0x60] sm:$0xff]  ;;  %v1576_v9 = vld [vmem:[#allocation6 + $0x68] sm:$0xff] }
 0x548   : > { %v4119_v12 = vpack.c.bf16 %v1576_v9, %v1575_v7 }
 0x549   : > { %4094 = vmatprep.subr.bf16.mxu0 %v4093_v11  ;;  %v1594_v11 = vld [vmem:[#allocation6 + $0xf8] sm:$0xff] }
 0x54a   : > { %4096 = vmatpush3.bf16.msra.mxu0 %v4095_v13  ;;  %v4121_v13 = vpack.c.bf16 %v1594_v11, %v1593_v10  ;;  %v1704_v10 = vld [vmem:[#allocation2 + $0x1b0] sm:$0xff]  ;;  %v1707_v11 = vld [vmem:[#allocation2 + $0x1c8] sm:$0xff] }
 0x619   : > { %v1401_v27 = vpop.f32.mrb[2].mxu0 }
 0x61a   : > { %v1402_v29 = vadd.f32 %v1401_v27, %v1334_v26  ;;  %v3790_v30 = vpop.f32.mrb[3].mxu0  ;;  %v1422_v26 = vsub.s32 4, %v4802_v14  ;;  %v1427_v27 = vsub.s32 5, %v4802_v14 }
 0x61c   : > { %v4953_v31 = vadd.f32 %v1402_v29, %v4788_v8  ;;  %v1444_v8 = vld [vmem:[#allocation4 + $0x70] sm:$0xff]  ;;  %v1423_v30 = vrot.slane %v4810_v16, %v1422_v26  ;;  %v1428_v34 = vrot.slane %v4810_v16, %v1427_v27 }
 0x61d   : > { %v4075_v44 = vpack.c.bf16 %v1444_v8, %v1442_v43  ;;  %v1583_v43 = vld [vmem:[#allocation6 + $0xa0] sm:$0xff]  ;;  %v1584_v8 = vld [vmem:[#allocation6 + $0xa8] sm:$0xff] }
 0x61e   : > { %1406 = vadd.xlane.f32.xlu0 %v4953_v31  ;;  %v1410_v32 = vmul.f32 %v4953_v31, %v4953_v31 }
 0x61f   : > { %4076 = vmatpush1.bf16.msra.mxu1 %v4075_v44  ;;  %v4101_v44 = vpack.c.bf16 %v1584_v8, %v1583_v43 }
 0x620   : > { %1411 = vadd.xlane.f32.xlu1 %v1410_v32  ;;  %4078 = vmatprep.subr.bf16.mxu1 %v4077_v47  ;;  %v4103_v47 = vpack.c.bf16 %v1568_v46, %v1567_v45 }
 0x623   : > { %4080 = vmatpush1.bf16.msra.mxu1 %v4079_v51  ;;  %v1569_v51 = vld [vmem:[#allocation6 + $0x30] sm:$0xff] }
 0x624   : > { %4082 = vmatprep.subr.bf16.mxu1 %v4081_v55  ;;  %v4107_v54 = vpack.c.bf16 %v1570_v52, %v1569_v51  ;;  %v1588_v55 = vld [vmem:[#allocation6 + $0xc8] sm:$0xff]  ;;  %v1702_v52 = vld [vmem:[#allocation2 + $0x1a0] sm:$0xff] }
 0x625   : > { %v1699_v51 = vld [vmem:[#allocation2 + $0x188] sm:$0xff] }
 0x627   : > { %4084 = vmatpush1.bf16.msra.mxu1 %v4083_v58  ;;  %v4109_v58 = vpack.c.bf16 %v1588_v55, %v1587_v53  ;;  %v1698_v53 = vld [vmem:[#allocation2 + $0x180] sm:$0xff]  ;;  %v1701_v55 = vld [vmem:[#allocation2 + $0x198] sm:$0xff] }
 0x628   : > { %4086 = vmatprep.subr.bf16.mxu1 %v4085_v59  ;;  %v1589_v59 = vld [vmem:[#allocation6 + $0xd0] sm:$0xff] }
 0x629   : > { %v4113_v62 = vpack.c.bf16 %v1590_v60, %v1589_v59  ;;  %v4158_v59 = vpack.c.bf16 %v1703_v57, %v1700_v56  ;;  %v1705_v60 = vld [vmem:[#allocation2 + $0x1b8] sm:$0xff]  ;;  %v1730_v56 = vld [vmem:[#allocation2 + $0x280] sm:$0xff] }
 0x62b   : > { %4088 = vmatpush1.bf16.msra.mxu1 %v4087_v2  ;;  %v1574_v2 = vld [vmem:[#allocation6 + $0x58] sm:$0xff] }
 0x62c   : > { %4090 = vmatprep.subr.bf16.mxu1 %v4089_v3  ;;  %v1591_v3 = vld [vmem:[#allocation6 + $0xe0] sm:$0xff]  ;;  %v4115_v5 = vpack.c.bf16 %v1574_v2, %v1573_v63  ;;  %v1668_v63 = vsub.s32 6, %v4802_v14 }
 0x62f   : > { %4092 = vmatpush1.bf16.msra.mxu1 %v4091_v6  ;;  %v4117_v6 = vpack.c.bf16 %v1592_v4, %v1591_v3 }
 0x6ab   : > { %v1407_v18 = vpop.xlane.xlu0 %1406 }
 0x6ac   : > { %v1409_v19 = vmul.f32 0.0078125, %v1407_v18  ;;  %v1577_v18 = vld [vmem:[#allocation6 + $0x70] sm:$0xff] }
 0x6ad   : > { %v1412_v20 = vpop.xlane.xlu1 %1411 }
 0x6ae   : > { %v1414_v21 = vmul.f32 %v1409_v19, %v1409_v19  ;;  %v1413_v22 = vmul.f32 0.0078125, %v1412_v20  ;;  %v1416_v29 = vsub.f32 %v4953_v31, %v1409_v19  ;;  %v4097_v31 = vpack.c.bf16 %v1582_v39, %v1581_v38  ;;  %v1578_v19 = vld [vmem:[#allocation6 + $0x78] sm:$0xff] }
 0x6af   : > { %v4123_v20 = vpack.c.bf16 %v1578_v19, %v1577_v18  ;;  %v1709_v18 = vld [vmem:[#allocation2 + $0x1d8] sm:$0xff] }
 0x6b0   : > { %v1415_v23 = vsub.f32 %v1413_v22, %v1414_v21  ;;  %4098 = vmatprep.subr.bf16.mxu0 %v4097_v31  ;;  %v1462_v21 = vld [vmem:[%s5226_s6] sm:$0x3] }
 0x6b1   : > { %4100 = vmatpush3.bf16.msra.mxu0 %v4099_v42  ;;  %v1467_v22 = vrot.slane %v1462_v21, %v4813_v17 }
 0x6b2   : > { %v1417_v24 = vadd.f32 1e-12, %v1415_v23  ;;  %4102 = vmatprep.subr.bf16.mxu0 %v4101_v44  ;;  %v1471_v23 = vrot.slane %v1462_v21, %v4805_v15  ;;  %v1714_v21 = vld [vmem:[#allocation2 + $0x200] sm:$0xff] }
 0x6b4   : > { %4394 = vrsqrt.f32 %v1417_v24 }
 0x6b5   : > { %4104 = vmatpush3.bf16.msra.mxu0 %v4103_v47 }
 0x6b6   : > { %4106 = vmatprep.subr.bf16.mxu0 %v4105_v50 }
 0x6b9   : > { %4108 = vmatpush3.bf16.msra.mxu0 %v4107_v54  ;;  %v4125_v54 = vpack.c.bf16 %v1702_v52, %v1699_v51  ;;  %v1732_v51 = vld [vmem:[#allocation2 + $0x290] sm:$0xff] }
 0x6ba   : > { %4110 = vmatprep.subr.bf16.mxu0 %v4109_v58  ;;  %v4127_v58 = vpack.c.bf16 %v1701_v55, %v1698_v53  ;;  %v1731_v55 = vld [vmem:[#allocation2 + $0x288] sm:$0xff] }
 0x6bb   : > { %4126 = vmatprep.subr.bf16.mxu1 %v4125_v54  ;;  %v1728_v54 = vld [vmem:[#allocation2 + $0x270] sm:$0xff] }
 0x6bc   : > { %v4147_v57 = vpack.c.bf16 %v1731_v55, %v1728_v54 }
 0x6bd   : > { %4112 = vmatpush3.bf16.msra.mxu0 %v4111_v61  ;;  %v1708_v61 = vld [vmem:[#allocation2 + $0x1d0] sm:$0xff] }
 0x6be   : > { %v4395_v32 = vpop.eup %4394  ;;  %4114 = vmatprep.subr.bf16.mxu0 %v4113_v62  ;;  %v4129_v62 = vpack.c.bf16 %v1708_v61, %v1705_v60  ;;  %v1738_v60 = vld [vmem:[#allocation2 + $0x2c0] sm:$0xff] }
 0x6bf   : > { %v1419_v33 = vmul.f32 %v4395_v32, %v1416_v29 }
 0x6c1   : > { %v1424_v36 = vmul.f32 %v1423_v30, %v1419_v33  ;;  %4116 = vmatpush3.bf16.msra.mxu0 %v4115_v5  ;;  %v1669_v5 = vrot.slane %v4810_v16, %v1668_v63 }
 0x6c2   : > { %4118 = vmatprep.subr.bf16.mxu0 %v4117_v6 }
 0x6c3   : > { %v4967_v37 = vadd.f32 %v1428_v34, %v1424_v36 }
 0x6c5   : > { %1539 = vmatmul.mubr.f32.vlgmr.msra.gmra.mrb[18].mxu1 %v4967_v37  ;;  %4120 = vmatpush3.bf16.msra.mxu0 %v4119_v12  ;;  %v1706_v12 = vld [vmem:[#allocation2 + $0x1c0] sm:$0xff] }
 0x6c6   : > { %1810 = vmatprep.mubr.f32.mxu1 %v4578_v0  ;;  %4122 = vmatprep.subr.bf16.mxu0 %v4121_v13  ;;  %v4131_v13 = vpack.c.bf16 %v1707_v11, %v1704_v10  ;;  %v4161_v19 = vpack.c.bf16 %v1709_v18, %v1706_v12  ;;  %v1743_v18 = vld [vmem:[#allocation2 + $0x2e8] sm:$0xff] }
 0x6c7   : > { %4128 = vmatpush1.bf16.msra.mxu1 %v4127_v58  ;;  %v1733_v58 = vld [vmem:[#allocation2 + $0x298] sm:$0xff] }
 0x6c8   : > { %4130 = vmatprep.subr.bf16.mxu1 %v4129_v62  ;;  %v4173_v61 = vpack.c.bf16 %v1733_v58, %v1730_v56 }
 0x6c9   : > { %4124 = vmatpush3.bf16.msra.mxu0 %v4123_v20  ;;  %v1711_v20 = vld [vmem:[#allocation2 + $0x1e8] sm:$0xff] }
 0x6ca   : > { %4157 = vmatprep.subr.bf16.mxu0 %v4579_v1 }
 0x6cb   : > { %4132 = vmatpush1.bf16.msra.mxu1 %v4131_v13  ;;  %v1740_v13 = vld [vmem:[#allocation2 + $0x2d0] sm:$0xff] }
 0x798   : > { %v1540_v24 = vpop.f32.mrb[18].mxu1 }
 0x799   : > { %v1541_v29 = vadd.f32 %v1540_v24, %v1467_v22  ;;  %v1542_v30 = vpop.f32.mrb[19].mxu1  ;;  %v4133_v22 = vpack.c.bf16 %v1714_v21, %v1711_v20  ;;  %v1712_v24 = vld [vmem:[#allocation2 + $0x1f0] sm:$0xff]  ;;  %v1745_v20 = vld [vmem:[#allocation2 + $0x2f8] sm:$0xff]  ;;  %v4155_v21 = vpack.c.bf16 %v1743_v18, %v1740_v13 }
 0x79a   : > { %v1543_v32 = vadd.f32 %v1542_v30, %v1471_v23  ;;  %v1713_v23 = vld [vmem:[#allocation2 + $0x1f8] sm:$0xff]  ;;  %v1715_v30 = vld [vmem:[#allocation2 + $0x208] sm:$0xff] }
 0x79b   : > { %v1547_v33 = vmul.f32 0.044715, %v1541_v29  ;;  %v1545_v48 = vmul.f32 0.5, %v1541_v29  ;;  %4134 = vmatprep.subr.bf16.mxu1 %v4133_v22 }
 0x79c   : > { %v1548_v34 = vmul.f32 0.044715, %v1543_v32  ;;  %v1546_v46 = vmul.f32 0.5, %v1543_v32 }
 0x79d   : > { %v1549_v36 = vmul.f32 %v1547_v33, %v1541_v29  ;;  %v1717_v33 = vld [vmem:[#allocation2 + $0x218] sm:$0xff] }
 0x79e   : > { %v1550_v38 = vmul.f32 %v1548_v34, %v1543_v32  ;;  %v1720_v34 = vld [vmem:[#allocation2 + $0x230] sm:$0xff] }
 0x79f   : > { %v1551_v39 = vmul.f32 %v1549_v36, %v1541_v29  ;;  %v4137_v36 = vpack.c.bf16 %v1720_v34, %v1717_v33  ;;  %v1686_v34 = vsub.s32 7, %v4802_v14  ;;  %v5196_v14 = vld [vmem:[%s5229_s9] sm:$0xf] }
 0x7a0   : > { %v1552_v31 = vmul.f32 %v1550_v38, %v1543_v32  ;;  %v1716_v38 = vld [vmem:[#allocation2 + $0x210] sm:$0xff] }
 0x7a1   : > { %v1553_v40 = vadd.f32 %v1551_v39, %v1541_v29  ;;  %v1719_v39 = vld [vmem:[#allocation2 + $0x228] sm:$0xff] }
 0x7a2   : > { %v1554_v41 = vadd.f32 %v1552_v31, %v1543_v32  ;;  %v4164_v32 = vpack.c.bf16 %v1715_v30, %v1712_v24  ;;  %v1718_v31 = vld [vmem:[#allocation2 + $0x220] sm:$0xff] }
 0x7a3   : > { %v1555_v42 = vmul.f32 0.7978846, %v1553_v40  ;;  %v4139_v40 = vpack.c.bf16 %v1719_v39, %v1716_v38  ;;  %v1687_v38 = vrot.slane %v4810_v16, %v1686_v34  ;;  %v5017_v16 = vld [vmem:[%s5227_s7 + $0x10] sm:$0xff] }
 0x7a4   : > { %v1556_v43 = vmul.f32 0.7978846, %v1554_v41  ;;  %v1721_v41 = vld [vmem:[#allocation2 + $0x238] sm:$0xff] }
 0x7a5   : > { %4396 = vtanh.f32 %v1555_v42  ;;  %v4167_v42 = vpack.c.bf16 %v1721_v41, %v1718_v31 }
 0x7a6   : > { %4398 = vtanh.f32 %v1556_v43  ;;  %v1723_v43 = vld [vmem:[#allocation2 + $0x248] sm:$0xff] }
 0x7af   : > { %v4397_v8 = vpop.eup %4396 }
 0x7b0   : > { %v4399_v44 = vpop.eup %4398  ;;  %v1559_v45 = vadd.f32 1.0, %v4397_v8  ;;  %v1726_v8 = vld [vmem:[#allocation2 + $0x260] sm:$0xff] }
 0x7b1   : > { %v1560_v47 = vadd.f32 1.0, %v4399_v44  ;;  %v4141_v44 = vpack.c.bf16 %v1726_v8, %v1723_v43  ;;  %v1895_v43 = vrot.slane %v5017_v16, %v4805_v15 }
 0x7b2   : > { %v1561_v50 = vmul.f32 %v1559_v45, %v1545_v48  ;;  %v1722_v45 = vld [vmem:[#allocation2 + $0x240] sm:$0xff] }
 0x7b3   : > { %v1562_v49 = vmul.f32 %v1560_v47, %v1546_v46  ;;  %v1725_v46 = vld [vmem:[#allocation2 + $0x258] sm:$0xff]  ;;  %v1724_v47 = vld [vmem:[#allocation2 + $0x250] sm:$0xff] }
 0x7b4   : > { %v4143_v48 = vpack.c.bf16 %v1725_v46, %v1722_v45 }
 0x7b5   : > { %1659 = vmatprep.mubr.f32.mxu0 %v1562_v49  ;;  %v1727_v49 = vld [vmem:[#allocation2 + $0x268] sm:$0xff] }
 0x7b6   : > { %1660 = vmatmul.mubr.f32.vlgmr.msra.gmra.mrb[4].mxu0 %v1561_v50  ;;  %v1729_v50 = vld [vmem:[#allocation2 + $0x278] sm:$0xff]  ;;  %v4170_v52 = vpack.c.bf16 %v1727_v49, %v1724_v47 }
 0x7b7   : > { %3823 = vmatprep.mubr.msk.f32.mxu0 %vm4580_vm0, %v4578_v0  ;;  %4159 = vmatpush3.bf16.msra.mxu0 %v4158_v59  ;;  %v4145_v53 = vpack.c.bf16 %v1732_v51, %v1729_v50  ;;  %v1735_v59 = vld [vmem:[#allocation2 + $0x2a8] sm:$0xff] }
 0x7b8   : > { %4160 = vmatprep.subr.bf16.mxu0 %v4579_v1  ;;  %v4149_v62 = vpack.c.bf16 %v1738_v60, %v1735_v59 }
 0x7bb   : > { %4162 = vmatpush3.bf16.msra.mxu0 %v4161_v19  ;;  %v1742_v19 = vld [vmem:[#allocation2 + $0x2e0] sm:$0xff] }
 0x7bc   : > { %4163 = vmatprep.subr.bf16.mxu0 %v4579_v1  ;;  %v4179_v22 = vpack.c.bf16 %v1745_v20, %v1742_v19 }
 0x7bf   : > { %4165 = vmatpush3.bf16.msra.mxu0 %v4164_v32 }
 0x7c0   : > { %4166 = vmatprep.subr.bf16.mxu0 %v4579_v1 }
 0x7c3   : > { %4168 = vmatpush3.bf16.msra.mxu0 %v4167_v42 }
 0x7c4   : > { %4169 = vmatprep.subr.bf16.mxu0 %v4579_v1 }
 0x7c7   : > { %4171 = vmatpush3.bf16.msra.mxu0 %v4170_v52  ;;  %v1900_v52 = vrot.slane %v5017_v16, %v630_v28 }
 0x7c8   : > { %4172 = vmatprep.subr.bf16.mxu0 %v4579_v1 }
 0x7cb   : > { %4174 = vmatpush3.bf16.msra.mxu0 %v4173_v61 }
 0x7cc   : > { %4175 = vmatprep.subr.bf16.mxu0 %v4579_v1 }
 0x889   : > { %v3555_v2 = vpop.f32.mrb[4].mxu0 }
 0x88a   : > { %v3556_v3 = vpop.f32.mrb[5].mxu0 }
 0x88b   : > { %v3557_v4 = vadd.f32 %v3556_v3, %v3555_v2  ;;  %v1734_v2 = vld [vmem:[#allocation2 + $0x2a0] sm:$0xff]  ;;  %v1737_v3 = vld [vmem:[#allocation2 + $0x2b8] sm:$0xff] }
 0x88c   : > { %v4151_v10 = vpack.c.bf16 %v1737_v3, %v1734_v2 }
 0x88d   : > { %v1665_v6 = vadd.f32 %v3557_v4, %v4967_v37  ;;  %v1710_v37 = vld [vmem:[#allocation2 + $0x1e0] sm:$0xff]  ;;  %v1736_v4 = vld [vmem:[#allocation2 + $0x2b0] sm:$0xff] }
 0x88e   : > { %v4135_v29 = vpack.c.bf16 %v1713_v23, %v1710_v37 }
 0x88f   : > { %v4985_v7 = vadd.f32 %v1669_v5, %v1665_v6  ;;  %v1739_v5 = vld [vmem:[#allocation2 + $0x2c8] sm:$0xff]  ;;  %v1741_v6 = vld [vmem:[#allocation2 + $0x2d8] sm:$0xff] }
 0x890   : > { %4136 = vmatpush1.bf16.msra.mxu1 %v4135_v29  ;;  %v4176_v11 = vpack.c.bf16 %v1739_v5, %v1736_v4 }
 0x891   : > { %1671 = vadd.xlane.f32.xlu0 %v4985_v7  ;;  %v1674_v9 = vmul.f32 %v4985_v7, %v4985_v7  ;;  %4138 = vmatprep.subr.bf16.mxu1 %v4137_v36 }
 0x892   : > { %4177 = vmatpush3.bf16.msra.mxu0 %v4176_v11 }
 0x893   : > { %4178 = vmatprep.subr.bf16.mxu0 %v4579_v1 }
 0x894   : > { %4140 = vmatpush1.bf16.msra.mxu1 %v4139_v40  ;;  %v3437_v40 = vld [vmem:[%s5227_s7 + $0x8] ss:$0 sm:$0xff] }
 0x895   : > { %1675 = vadd.xlane.f32.xlu0 %v1674_v9  ;;  %4142 = vmatprep.subr.bf16.mxu1 %v4141_v44  ;;  %v1744_v9 = vld [vmem:[#allocation2 + $0x2f0] sm:$0xff] }
 0x896   : > { %v4153_v12 = vpack.c.bf16 %v1744_v9, %v1741_v6  ;;  %4180 = vmatpush3.bf16.msra.mxu0 %v4179_v22 }
 0x897   : > { %4181 = vmatprep.subr.bf16.mxu0 %v4579_v1 }
 0x898   : > { %4144 = vmatpush1.bf16.msra.mxu1 %v4143_v48 }
 0x899   : > { %4146 = vmatprep.subr.bf16.mxu1 %v4145_v53 }
 0x89c   : > { %4148 = vmatpush1.bf16.msra.mxu1 %v4147_v57 }
 0x89d   : > { %4150 = vmatprep.subr.bf16.mxu1 %v4149_v62 }
 0x8a0   : > { %4152 = vmatpush1.bf16.msra.mxu1 %v4151_v10 }
 0x8a1   : > { %4154 = vmatprep.subr.bf16.mxu1 %v4153_v12 }
 0x8a4   : > { %4156 = vmatpush1.bf16.msra.mxu1 %v4155_v21 }
 0x8a5   : > { %3826 = vmatprep.subr.mxu1 %v4578_v0 }
 0x91e   : > { %v1672_v37 = vpop.xlane.xlu0 %1671 }
 0x91f   : > { %v1673_v23 = vmul.f32 0.0078125, %v1672_v37 }
 0x921   : > { %v1678_v29 = vmul.f32 %v1673_v23, %v1673_v23  ;;  %v1680_v36 = vsub.f32 %v4985_v7, %v1673_v23  ;;  %v1890_v7 = vrot.slane %v5017_v16, %v4813_v17 }
 0x922   : > { %v1676_v24 = vpop.xlane.xlu0 %1675 }
 0x923   : > { %v1677_v30 = vmul.f32 0.0078125, %v1676_v24 }
 0x925   : > { %v1679_v32 = vsub.f32 %v1677_v30, %v1678_v29 }
 0x927   : > { %v1681_v33 = vadd.f32 1e-12, %v1679_v32 }
 0x929   : > { %4400 = vrsqrt.f32 %v1681_v33 }
 0x933   : > { %v4401_v39 = vpop.eup %4400 }
 0x934   : > { %v1683_v31 = vmul.f32 %v4401_v39, %v1680_v36 }
 0x936   : > { %v1688_v41 = vmul.f32 %v1687_v38, %v1683_v31 }
 0x938   : > { %v5006_v42 = vadd.f32 %v3437_v40, %v1688_v41 }
 0x93a   : > { %1811 = vmatmul.mubr.f32.vlgmr.msra.gmra.mrb[20].mxu1 %v5006_v42  ;;  %3824 = vmatmul.mubr.f32.vlgmr.msra.gmra.mrb[6].mxu0 %v5006_v42 }
 0x93b   : > { %3828 = vmatprep.mubr.msk.f32.mxu1 %vm4580_vm0, %v4578_v0  ;;  %3898 = vmatprep.mubr.msk.f32.mxu0 %vm4580_vm0, %v4578_v0 }
 0xa0d   : > { %v1812_v8 = vpop.f32.mrb[20].mxu1  ;;  %v1883_v44 = vpop.f32.mrb[6].mxu0 }
 0xa0e   : > { %v1891_v45 = vadd.f32 %v1890_v7, %v1812_v8  ;;  %v1814_v46 = vpop.f32.mrb[21].mxu1  ;;  %v3825_v47 = vpop.f32.mrb[7].mxu0  ;;  %v1901_v55 = vadd.f32 %v1900_v52, %v1883_v44 }
 0xa0f   : > { %v1896_v48 = vadd.f32 %v1895_v43, %v1814_v46 }
 0xa10   : > { %1978 = vrot.lane.b32.xlu0 %v1891_v45, %s4582_s18 }
 0xa11   : > { %1980 = vrot.lane.b32.xlu1 %v1896_v48, %s4582_s18  ;;  %3827 = vmatpush3.xpose.msk.msra.mxu1 %vm640_vm1, %v1896_v48 }
 0xa12   : > { %3831 = vmatprep.subr.mxu1 %v4578_v0 }
 0xa14   : > { %2136 = vrot.lane.b32.xlu0 %v1896_v48, %s4583_s21  ;;  %3829 = vmatmul.mubr.msk.f32.vlgmr.msra.gmra.mrb[22].mxu1 %vm640_vm1, %v1891_v45 }
 0xa15   : > { %2058 = vrot.lane.b32.xlu1 %v1896_v48, %s4581_s14  ;;  %3833 = vmatprep.mubr.msk.f32.mxu1 %vm4580_vm0, %v4578_v0 }
 0xa19   : > { %2056 = vrot.lane.b32.xlu1 %v1891_v45, %s4581_s14 }
 0xa1d   : > { %2134 = vrot.lane.b32.xlu1 %v1891_v45, %s4583_s21 }
 0xa82   : > { %v1979_v50 = vpop.permute.xlu0 %1978 }
 0xa83   : > { %v1981_v49 = vpop.permute.xlu1 %1980 }
 0xa84   : > { %3832 = vmatpush3.xpose.msk.msra.mxu1 %vm640_vm1, %v1981_v49 }
 0xa85   : > { %3836 = vmatprep.subr.mxu1 %v4578_v0 }
 0xa86   : > { %v2137_v54 = vpop.permute.xlu0 %2136 }
 0xa87   : > { %v2059_v51 = vpop.permute.xlu1 %2058  ;;  %3834 = vmatmul.mubr.msk.f32.vlgmr.msra.gmra.mrb[24].mxu1 %vm640_vm1, %v1979_v50 }
 0xa88   : > { %3837 = vmatpush3.xpose.msk.msra.mxu1 %vm640_vm1, %v2059_v51  ;;  %3838 = vmatprep.mubr.msk.f32.mxu1 %vm4580_vm0, %v4578_v0 }
 0xa89   : > { %3841 = vmatprep.subr.mxu1 %v4578_v0 }
 0xa8b   : > { %v2057_v53 = vpop.permute.xlu1 %2056 }
 0xa8c   : > { %3839 = vmatmul.mubr.msk.f32.vlgmr.msra.gmra.mrb[26].mxu1 %vm640_vm1, %v2057_v53 }
 0xa8d   : > { %3842 = vmatpush3.xpose.msk.msra.mxu1 %vm640_vm1, %v2137_v54  ;;  %3843 = vmatprep.mubr.msk.f32.mxu1 %vm4580_vm0, %v4578_v0 }
 0xa8e   : > { %3846 = vmatprep.subr.mxu1 %v4578_v0 }
 0xa8f   : > { %v2135_v56 = vpop.permute.xlu1 %2134 }
 0xa90   : > { %3844 = vmatmul.mubr.msk.f32.vlgmr.msra.gmra.mrb[28].mxu1 %vm640_vm1, %v2135_v56  ;;  %v3452_v56 = vld [vmem:[%s5223_s3 + $0x80] sm:$0xff] }
 0xa91   : > { %3847 = vmatpush3.msra.mxu1 %v1901_v55  ;;  %3848 = vmatprep.mubr.msk.f32.mxu1 %vm4580_vm0, %v4578_v0 }
 0xa92   : > { %3851 = vmatprep.subr.mxu1 %v4578_v0 }
 0xae7   : > { %v1974_v28 = vpop.f32.mrb[22].mxu1 }
 0xae8   : > { %v1975_v57 = vadd.f32 %v4857_v35, %v1974_v28  ;;  %v3830_v58 = vpop.f32.mrb[23].mxu1  ;;  %v3453_v28 = vld [vmem:[%s5223_s3 + $0x88] sm:$0xff] }
 0xae9   : > { %v4182_v58 = vpack.c.bf16 %v3453_v28, %v3452_v56 }
 0xaea   : > { %v2212_v59 = vsel %vm951_vm2, %v1975_v57, -inf }
 0xaeb   : > { %2213 = vmax.xlane.f32.xlu0 %v2212_v59  ;;  %v3455_v59 = vld [vmem:[%s5223_s3 + $0x98] sm:$0xff]  ;;  %4183 = vmatpush3.bf16.msra.mxu0 %v4182_v58 }
 0xaec   : > { %4184 = vmatprep.subr.bf16.mxu0 %v4579_v1 }
 0xb5a   : > { %v2052_v60 = vpop.f32.mrb[24].mxu1 }
 0xb5b   : > { %v2053_v61 = vadd.f32 %v4857_v35, %v2052_v60  ;;  %v3835_v62 = vpop.f32.mrb[25].mxu1 }
 0xb5c   : > { %v3457_v62 = vld [vmem:[%s5223_s3 + $0xa8] sm:$0xff] }
 0xb5d   : > { %v2215_v2 = vsel %vm951_vm2, %v2053_v61, -inf }
 0xb5e   : > { %2216 = vmax.xlane.f32.xlu1 %v2215_v2 }
 0xb5f   : > { %v2130_v3 = vpop.f32.mrb[26].mxu1 }
 0xb60   : > { %v2131_v4 = vadd.f32 %v4857_v35, %v2130_v3  ;;  %v3840_v5 = vpop.f32.mrb[27].mxu1  ;;  %v3458_v3 = vld [vmem:[%s5223_s3 + $0xb0] sm:$0xff] }
 0xb62   : > { %v2218_v6 = vsel %vm951_vm2, %v2131_v4, -inf }
 0xb63   : > { %2219 = vmax.xlane.f32.xlu0 %v2218_v6  ;;  %v2208_v9 = vpop.f32.mrb[28].mxu1  ;;  %v3460_v6 = vld [vmem:[%s5223_s3 + $0xc0] sm:$0xff] }
 0xb64   : > { %v2209_v10 = vadd.f32 %v4857_v35, %v2208_v9  ;;  %v3845_v11 = vpop.f32.mrb[29].mxu1  ;;  %v3461_v9 = vld [vmem:[%s5223_s3 + $0xc8] sm:$0xff] }
 0xb66   : > { %v2221_v12 = vsel %vm951_vm2, %v2209_v10, -inf }
 0xb67   : > { %2222 = vmax.xlane.f32.xlu0 %v2221_v12  ;;  %v4194_v12 = vpack.c.bf16 %v3461_v9, %v3460_v6  ;;  %v2701_v6 = vld [vmem:[#allocation4 + $0x160] sm:$0xff] }
 0xb6f   : > { %2330 = vrot.lane.b32.xlu1 %v1901_v55, %s4582_s18 }
 0xb78   : > { %v2214_v13 = vpop.xlane.xlu0 %2213 }
 0xb79   : > { %v2224_v18 = vsub.f32 %v1975_v57, %v2214_v13  ;;  %v3454_v57 = vld [vmem:[%s5223_s3 + $0x90] sm:$0xff] }
 0xb7a   : > { %v4185_v60 = vpack.c.bf16 %v3455_v59, %v3454_v57  ;;  %v3462_v13 = vld [vmem:[%s5223_s3 + $0xd0] sm:$0xff]  ;;  %v2698_v59 = vld [vmem:[#allocation4 + $0x148] sm:$0xff] }
 0xb7b   : > { %v2228_v19 = vmul.f32 1.442695, %v2224_v18  ;;  %v3463_v18 = vld [vmem:[%s5223_s3 + $0xd8] sm:$0xff] }
 0xb7c   : > { %4186 = vmatpush3.bf16.msra.mxu0 %v4185_v60  ;;  %v2700_v60 = vld [vmem:[#allocation4 + $0x158] sm:$0xff] }
 0xb7d   : > { %4402 = vpow2.f32 %v2228_v19  ;;  %4187 = vmatprep.subr.bf16.mxu0 %v4579_v1  ;;  %v4197_v19 = vpack.c.bf16 %v3463_v18, %v3462_v13  ;;  %v2705_v13 = vld [vmem:[#allocation4 + $0x180] sm:$0xff]  ;;  %v2707_v18 = vld [vmem:[#allocation4 + $0x190] sm:$0xff] }
 0xb87   : > { %v4403_v20 = vpop.eup %4402 }
 0xb88   : > { %v2236_v21 = vsel %vm951_vm2, %v4403_v20, 0.0 }
 0xb93   : > { %2237 = vadd.xlane.f32.xlu1 %v2236_v21  ;;  %v3465_v21 = vld [vmem:[%s5223_s3 + $0xe8] sm:$0xff] }
 0xbeb   : > { %v2217_v22 = vpop.xlane.xlu1 %2216 }
 0xbec   : > { %v2225_v37 = vsub.f32 %v2053_v61, %v2217_v22  ;;  %v3456_v61 = vld [vmem:[%s5223_s3 + $0xa0] sm:$0xff] }
 0xbed   : > { %v4188_v2 = vpack.c.bf16 %v3457_v62, %v3456_v61  ;;  %v4213_v61 = vpack.c.bf16 %v2700_v60, %v2698_v59  ;;  %v2697_v62 = vld [vmem:[#allocation4 + $0x140] sm:$0xff]  ;;  %v2686_v59 = vrot.slane %v5017_v16, %v1427_v27 }
 0xbee   : > { %v2230_v23 = vmul.f32 1.442695, %v2225_v37  ;;  %v3466_v37 = vld [vmem:[%s5223_s3 + $0xf0] sm:$0xff]  ;;  %v2828_v27 = vld [vmem:[#allocation6 + $0x120] sm:$0xff] }
 0xbef   : > { %v2331_v7 = vpop.permute.xlu1 %2330  ;;  %4189 = vmatpush3.bf16.msra.mxu0 %v4188_v2  ;;  %v2699_v2 = vld [vmem:[#allocation4 + $0x150] sm:$0xff] }
 0xbf0   : > { %4404 = vpow2.f32 %v2230_v23  ;;  %v2220_v24 = vpop.xlane.xlu0 %2219  ;;  %4190 = vmatprep.subr.bf16.mxu0 %v4579_v1  ;;  %v3467_v23 = vld [vmem:[%s5223_s3 + $0xf8] sm:$0xff] }
 0xbf1   : > { %v2226_v35 = vsub.f32 %v2131_v4, %v2220_v24  ;;  %v3459_v4 = vld [vmem:[%s5223_s3 + $0xb8] sm:$0xff]  ;;  %v4203_v24 = vpack.c.bf16 %v3467_v23, %v3466_v37  ;;  %v2711_v37 = vld [vmem:[#allocation4 + $0x1b0] sm:$0xff] }
 0xbf2   : > { %v4191_v5 = vpack.c.bf16 %v3459_v4, %v3458_v3  ;;  %v4215_v3 = vpack.c.bf16 %v2699_v2, %v2697_v62  ;;  %v2704_v4 = vld [vmem:[#allocation4 + $0x178] sm:$0xff]  ;;  %v2842_v62 = vld [vmem:[#allocation6 + $0x190] sm:$0xff] }
 0xbf3   : > { %v2232_v29 = vmul.f32 1.442695, %v2226_v35 }
 0xbf4   : > { %v2223_v30 = vpop.xlane.xlu0 %2222  ;;  %4192 = vmatpush3.bf16.msra.mxu0 %v4191_v5 }
 0xbf5   : > { %4406 = vpow2.f32 %v2232_v29  ;;  %v2227_v32 = vsub.f32 %v2209_v10, %v2223_v30  ;;  %4193 = vmatprep.subr.bf16.mxu0 %v4579_v1 }
 0xbf7   : > { %v2234_v33 = vmul.f32 1.442695, %v2227_v32 }
 0xbf8   : > { %4195 = vmatpush3.bf16.msra.mxu0 %v4194_v12 }
 0xbf9   : > { %4408 = vpow2.f32 %v2234_v33  ;;  %4196 = vmatprep.subr.bf16.mxu0 %v4579_v1 }
 0xbfa   : > { %v4405_v36 = vpop.eup %4404 }
 0xbfb   : > { %v2239_v38 = vsel %vm951_vm2, %v4405_v36, 0.0 }
 0xbfc   : > { %2240 = vadd.xlane.f32.xlu0 %v2239_v38  ;;  %4198 = vmatpush3.bf16.msra.mxu0 %v4197_v19  ;;  %v2710_v19 = vld [vmem:[#allocation4 + $0x1a8] sm:$0xff] }
 0xbfd   : > { %4199 = vmatprep.subr.bf16.mxu0 %v4579_v1 }
 0xbff   : > { %v4407_v39 = vpop.eup %4406 }
 0xc00   : > { %v2242_v31 = vsel %vm951_vm2, %v4407_v39, 0.0 }
 0xc01   : > { %2243 = vadd.xlane.f32.xlu1 %v2242_v31 }
 0xc03   : > { %v4409_v40 = vpop.eup %4408 }
 0xc04   : > { %v2245_v41 = vsel %vm951_vm2, %v4409_v40, 0.0 }
 0xc05   : > { %2246 = vadd.xlane.f32.xlu0 %v2245_v41 }
 0xc12   : > { %2482 = vrot.lane.b32.xlu1 %v1901_v55, %s4583_s21 }
 0xc1b   : > { %2406 = vrot.lane.b32.xlu0 %v1901_v55, %s4581_s14 }
 0xc20   : > { %v2238_v43 = vpop.xlane.xlu1 %2237 }
 0xc21   : > { %4410 = vrcp.f32 %v2238_v43  ;;  %v2690_v43 = vld [vmem:[#allocation4 + $0x108] sm:$0xff] }
 0xc2b   : > { %v4411_v8 = vpop.eup %4410 }
 0xc2c   : > { %v2252_v44 = vmul.f32 %v4411_v8, %v4403_v20  ;;  %v3464_v20 = vld [vmem:[%s5223_s3 + $0xe0] sm:$0xff]  ;;  %v2692_v8 = vld [vmem:[#allocation4 + $0x118] sm:$0xff] }
 0xc2d   : > { %v4200_v22 = vpack.c.bf16 %v3465_v21, %v3464_v20  ;;  %v4223_v20 = vpack.c.bf16 %v2707_v18, %v2705_v13  ;;  %v2712_v21 = vld [vmem:[#allocation4 + $0x1b8] sm:$0xff]  ;;  %v2830_v13 = vld [vmem:[#allocation6 + $0x130] sm:$0xff] }
 0xc2e   : > { %3849 = vmatmul.mubr.msk.f32.vlgmr.msra.gmra.mrb[30].mxu1 %vm951_vm2, %v2252_v44  ;;  %v2689_v44 = vld [vmem:[#allocation4 + $0x100] sm:$0xff]  ;;  %v4225_v23 = vpack.c.bf16 %v2712_v21, %v2710_v19  ;;  %v2831_v18 = vld [vmem:[#allocation6 + $0x138] sm:$0xff]  ;;  %v2849_v21 = vld [vmem:[#allocation6 + $0x1c8] sm:$0xff] }
 0xc2f   : > { %3852 = vmatpush3.msra.mxu1 %v2331_v7  ;;  %3853 = vmatprep.mubr.msk.f32.mxu1 %vm4580_vm0, %v4578_v0  ;;  %v2848_v19 = vld [vmem:[#allocation6 + $0x1c0] sm:$0xff] }
 0xc30   : > { %3856 = vmatprep.subr.mxu1 %v4578_v0  ;;  %4201 = vmatpush3.bf16.msra.mxu0 %v4200_v22  ;;  %v2709_v22 = vld [vmem:[#allocation4 + $0x1a0] sm:$0xff] }
 0xc31   : > { %4202 = vmatprep.subr.bf16.mxu0 %v4579_v1 }
 0xc34   : > { %4204 = vmatpush3.bf16.msra.mxu0 %v4203_v24  ;;  %v2714_v24 = vld [vmem:[#allocation4 + $0x1c8] sm:$0xff] }
 0xc89   : > { %v2241_v45 = vpop.xlane.xlu0 %2240 }
 0xc8a   : > { %4412 = vrcp.f32 %v2241_v45  ;;  %v4205_v45 = vpack.c.bf16 %v2692_v8, %v2690_v43  ;;  %v2840_v43 = vld [vmem:[#allocation6 + $0x180] sm:$0xff]  ;;  %v2841_v8 = vld [vmem:[#allocation6 + $0x188] sm:$0xff] }
 0xc8e   : > { %v2244_v46 = vpop.xlane.xlu1 %2243 }
 0xc8f   : > { %4414 = vrcp.f32 %v2244_v46  ;;  %v2691_v46 = vld [vmem:[#allocation4 + $0x110] sm:$0xff] }
 0xc92   : > { %v2247_v47 = vpop.xlane.xlu0 %2246  ;;  %v2483_v53 = vpop.permute.xlu1 %2482 }
 0xc93   : > { %4416 = vrcp.f32 %v2247_v47  ;;  %v2694_v47 = vld [vmem:[#allocation4 + $0x128] sm:$0xff] }
 0xc94   : > { %v4413_v48 = vpop.eup %4412 }
 0xc95   : > { %v2253_v49 = vmul.f32 %v4413_v48, %v4405_v36  ;;  %v2696_v48 = vld [vmem:[#allocation4 + $0x138] sm:$0xff] }
 0xc96   : > { %v2407_v50 = vpop.permute.xlu0 %2406 }
 0xc97   : > { %3854 = vmatmul.mubr.msk.f32.vlgmr.msra.gmra.mrb[32].mxu1 %vm951_vm2, %v2253_v49  ;;  %v4207_v49 = vpack.c.bf16 %v2691_v46, %v2689_v44  ;;  %v2824_v44 = vld [vmem:[#allocation6 + $0x100] sm:$0xff]  ;;  %v2825_v46 = vld [vmem:[#allocation6 + $0x108] sm:$0xff] }
 0xc98   : > { %3857 = vmatpush3.msra.mxu1 %v2407_v50  ;;  %3858 = vmatprep.mubr.msk.f32.mxu1 %vm4580_vm0, %v4578_v0  ;;  %v4209_v50 = vpack.c.bf16 %v2696_v48, %v2694_v47  ;;  %v4239_v47 = vpack.c.bf16 %v2825_v46, %v2824_v44  ;;  %v2839_v46 = vld [vmem:[#allocation6 + $0x178] sm:$0xff] }
 0xc99   : > { %v4415_v51 = vpop.eup %4414  ;;  %3861 = vmatprep.subr.mxu1 %v4578_v0 }
 0xc9a   : > { %v2254_v52 = vmul.f32 %v4415_v51, %v4407_v39  ;;  %v2693_v51 = vld [vmem:[#allocation4 + $0x120] sm:$0xff] }
 0xc9c   : > { %3859 = vmatmul.mubr.msk.f32.vlgmr.msra.gmra.mrb[34].mxu1 %vm951_vm2, %v2254_v52  ;;  %v2695_v52 = vld [vmem:[#allocation4 + $0x130] sm:$0xff] }
 0xc9d   : > { %v4417_v54 = vpop.eup %4416  ;;  %3862 = vmatpush3.msra.mxu1 %v2483_v53  ;;  %3863 = vmatprep.mubr.msk.f32.mxu1 %vm4580_vm0, %v4578_v0  ;;  %v4211_v53 = vpack.c.bf16 %v2695_v52, %v2693_v51 }
 0xc9e   : > { %v2255_v55 = vmul.f32 %v4417_v54, %v4409_v40  ;;  %4206 = vmatprep.subr.bf16.mxu1 %v4205_v45  ;;  %v2593_v54 = vrot.slane %v5017_v16, %v1333_v25  ;;  %v2702_v25 = vld [vmem:[#allocation4 + $0x168] sm:$0xff]  ;;  %v4237_v45 = vpack.c.bf16 %v2841_v8, %v2840_v43  ;;  %v2855_v43 = vld [vmem:[#allocation6 + $0x1f8] sm:$0xff] }
 0xc9f   : > { %v4217_v5 = vpack.c.bf16 %v2704_v4, %v2702_v25  ;;  %v2827_v25 = vld [vmem:[#allocation6 + $0x118] sm:$0xff]  ;;  %v2844_v4 = vld [vmem:[#allocation6 + $0x1a0] sm:$0xff] }
 0xca0   : > { %3864 = vmatmul.mubr.msk.f32.vlgmr.msra.gmra.mrb[36].mxu1 %vm951_vm2, %v2255_v55  ;;  %4238 = vmatprep.subr.bf16.mxu0 %v4237_v45  ;;  %v2838_v45 = vld [vmem:[#allocation6 + $0x170] sm:$0xff] }
 0xca1   : > { %2798 = vmatprep.mubr.f32.mxu1 %v4578_v0  ;;  %4208 = vmatpush1.bf16.msra.mxu1 %v4207_v49 }
 0xca2   : > { %4210 = vmatprep.subr.bf16.mxu1 %v4209_v50 }
 0xca5   : > { %4212 = vmatpush1.bf16.msra.mxu1 %v4211_v53 }
 0xca6   : > { %4214 = vmatprep.subr.bf16.mxu1 %v4213_v61 }
 0xca9   : > { %4216 = vmatpush1.bf16.msra.mxu1 %v4215_v3  ;;  %v2826_v3 = vld [vmem:[#allocation6 + $0x110] sm:$0xff] }
 0xcaa   : > { %4218 = vmatprep.subr.bf16.mxu1 %v4217_v5  ;;  %v2845_v5 = vld [vmem:[#allocation6 + $0x1a8] sm:$0xff] }
 0xd01   : > { %v2325_v10 = vpop.f32.mrb[30].mxu1 }
 0xd02   : > { %v3850_v11 = vpop.f32.mrb[31].mxu1 }
 0xd03   : > { %v2708_v11 = vld [vmem:[#allocation4 + $0x198] sm:$0xff] }
 0xd6a   : > { %v2402_v35 = vpop.f32.mrb[32].mxu1 }
 0xd6b   : > { %2559 = vrot.lane.b32.xlu1 %v2402_v35, %s4583_s21  ;;  %v3855_v29 = vpop.f32.mrb[33].mxu1  ;;  %v2716_v35 = vld [vmem:[#allocation4 + $0x1d8] sm:$0xff] }
 0xd6c   : > { %v4227_v29 = vpack.c.bf16 %v2711_v37, %v2709_v22  ;;  %v2832_v22 = vld [vmem:[#allocation6 + $0x140] sm:$0xff]  ;;  %v2833_v37 = vld [vmem:[#allocation6 + $0x148] sm:$0xff] }
 0xd6f   : > { %v2478_v30 = vpop.f32.mrb[34].mxu1 }
 0xd70   : > { %2563 = vrot.lane.b32.xlu0 %v2478_v30, %s4581_s14  ;;  %v3860_v32 = vpop.f32.mrb[35].mxu1  ;;  %v4229_v30 = vpack.c.bf16 %v2716_v35, %v2714_v24  ;;  %v2850_v24 = vld [vmem:[#allocation6 + $0x1d0] sm:$0xff]  ;;  %v2851_v35 = vld [vmem:[#allocation6 + $0x1d8] sm:$0xff] }
 0xd71   : > { %v2713_v32 = vld [vmem:[#allocation4 + $0x1c0] sm:$0xff] }
 0xd73   : > { %v2554_v33 = vpop.f32.mrb[36].mxu1 }
 0xd74   : > { %2567 = vrot.lane.b32.xlu1 %v2554_v33, %s4582_s18  ;;  %v3865_v36 = vpop.f32.mrb[37].mxu1  ;;  %v2715_v33 = vld [vmem:[#allocation4 + $0x1d0] sm:$0xff] }
 0xd75   : > { %v2718_v36 = vld [vmem:[#allocation4 + $0x1e8] sm:$0xff] }
 0xddd   : > { %v2560_v38 = vpop.permute.xlu1 %2559 }
 0xdde   : > { %v2570_v31 = vsel %vm640_vm1, %v2325_v10, %v2560_v38  ;;  %v2706_v10 = vld [vmem:[#allocation4 + $0x188] sm:$0xff]  ;;  %v2720_v38 = vld [vmem:[#allocation4 + $0x1f8] sm:$0xff] }
 0xddf   : > { %v4221_v12 = vpack.c.bf16 %v2708_v11, %v2706_v10  ;;  %v2846_v10 = vld [vmem:[#allocation6 + $0x1b0] sm:$0xff]  ;;  %v2847_v11 = vld [vmem:[#allocation6 + $0x1b8] sm:$0xff] }
 0xde2   : > { %v2564_v39 = vpop.permute.xlu0 %2563 }
 0xde3   : > { %v2571_v40 = vsel %vm1311_vm3, %v2570_v31, %v2564_v39  ;;  %v4231_v39 = vpack.c.bf16 %v2715_v33, %v2713_v32  ;;  %v4233_v31 = vpack.c.bf16 %v2720_v38, %v2718_v36  ;;  %v2834_v32 = vld [vmem:[#allocation6 + $0x150] sm:$0xff]  ;;  %v2835_v33 = vld [vmem:[#allocation6 + $0x158] sm:$0xff]  ;;  %v2852_v36 = vld [vmem:[#allocation6 + $0x1e0] sm:$0xff] }
 0xde4   : > { %v2853_v38 = vld [vmem:[#allocation6 + $0x1e8] sm:$0xff] }
 0xde6   : > { %v2568_v41 = vpop.permute.xlu1 %2567 }
 0xde7   : > { %v2572_v7 = vsel %vm1313_vm4, %v2571_v40, %v2568_v41  ;;  %v2717_v40 = vld [vmem:[#allocation4 + $0x1e0] sm:$0xff]  ;;  %v2719_v41 = vld [vmem:[#allocation4 + $0x1f0] sm:$0xff] }
 0xde8   : > { %3899 = vmatmul.mubr.f32.vlgmr.msra.gmra.mrb[8].mxu0 %v2572_v7  ;;  %v4235_v7 = vpack.c.bf16 %v2719_v41, %v2717_v40  ;;  %v2836_v40 = vld [vmem:[#allocation6 + $0x160] sm:$0xff]  ;;  %v2837_v41 = vld [vmem:[#allocation6 + $0x168] sm:$0xff] }
 0xde9   : > { %4240 = vmatpush3.bf16.msra.mxu0 %v4239_v47  ;;  %v4263_v8 = vpack.c.bf16 %v2837_v41, %v2836_v40  ;;  %v4267_v47 = vpack.c.bf16 %v2839_v46, %v2838_v45  ;;  %v2967_v40 = vld [vmem:[#allocation7 + $0x60] sm:$0xff]  ;;  %v2968_v41 = vld [vmem:[#allocation7 + $0x68] sm:$0xff] }
 0xebb   : > { %v2660_v55 = vpop.f32.mrb[8].mxu0 }
 0xebc   : > { %v2661_v56 = vadd.f32 %v2660_v55, %v2593_v54  ;;  %v3900_v28 = vpop.f32.mrb[9].mxu0 }
 0xebe   : > { %v5146_v57 = vadd.f32 %v2661_v56, %v5006_v42  ;;  %v2703_v42 = vld [vmem:[#allocation4 + $0x170] sm:$0xff]  ;;  %v2681_v56 = vrot.slane %v5017_v16, %v1422_v26  ;;  %v4243_v26 = vpack.c.bf16 %v2827_v25, %v2826_v3 }
 0xebf   : > { %v4219_v9 = vpack.c.bf16 %v2703_v42, %v2701_v6  ;;  %v4245_v6 = vpack.c.bf16 %v2845_v5, %v2844_v4  ;;  %v2829_v42 = vld [vmem:[#allocation6 + $0x128] sm:$0xff] }
 0xec0   : > { %2665 = vadd.xlane.f32.xlu0 %v5146_v57  ;;  %v2668_v58 = vmul.f32 %v5146_v57, %v5146_v57 }
 0xec1   : > { %4220 = vmatpush1.bf16.msra.mxu1 %v4219_v9  ;;  %v4247_v9 = vpack.c.bf16 %v2829_v42, %v2828_v27  ;;  %v2955_v42 = vld [vmem:[#allocation7] sm:$0xff] }
 0xec2   : > { %2669 = vadd.xlane.f32.xlu1 %v2668_v58  ;;  %4222 = vmatprep.subr.bf16.mxu1 %v4221_v12  ;;  %v4249_v12 = vpack.c.bf16 %v2847_v11, %v2846_v10  ;;  %v2957_v10 = vld [vmem:[#allocation7 + $0x10] sm:$0xff] }
 0xec5   : > { %4224 = vmatpush1.bf16.msra.mxu1 %v4223_v20  ;;  %v4251_v20 = vpack.c.bf16 %v2831_v18, %v2830_v13 }
 0xec6   : > { %4226 = vmatprep.subr.bf16.mxu1 %v4225_v23  ;;  %v4253_v23 = vpack.c.bf16 %v2849_v21, %v2848_v19  ;;  %v2930_v21 = vrot.slane %v5017_v16, %v1668_v63  ;;  %v2964_v63 = vld [vmem:[#allocation7 + $0x48] sm:$0xff] }
 0xec9   : > { %4228 = vmatpush1.bf16.msra.mxu1 %v4227_v29  ;;  %v4255_v29 = vpack.c.bf16 %v2833_v37, %v2832_v22 }
 0xeca   : > { %4230 = vmatprep.subr.bf16.mxu1 %v4229_v30  ;;  %v4257_v30 = vpack.c.bf16 %v2851_v35, %v2850_v24  ;;  %v2959_v24 = vld [vmem:[#allocation7 + $0x20] sm:$0xff]  ;;  %v2960_v35 = vld [vmem:[#allocation7 + $0x28] sm:$0xff] }
 0xecd   : > { %4232 = vmatpush1.bf16.msra.mxu1 %v4231_v39  ;;  %v4259_v39 = vpack.c.bf16 %v2835_v33, %v2834_v32  ;;  %v2962_v32 = vld [vmem:[#allocation7 + $0x38] sm:$0xff] }
 0xece   : > { %4234 = vmatprep.subr.bf16.mxu1 %v4233_v31  ;;  %v4261_v31 = vpack.c.bf16 %v2853_v38, %v2852_v36  ;;  %v2963_v36 = vld [vmem:[#allocation7 + $0x40] sm:$0xff] }
 0xecf   : > { %v4282_v38 = vpack.c.bf16 %v2964_v63, %v2963_v36  ;;  %v2981_v36 = vld [vmem:[#allocation7 + $0xc8] sm:$0xff]  ;;  %v2982_v63 = vld [vmem:[#allocation7 + $0xd0] sm:$0xff] }
 0xed1   : > { %4236 = vmatpush1.bf16.msra.mxu1 %v4235_v7  ;;  %v2854_v7 = vld [vmem:[#allocation6 + $0x1f0] sm:$0xff] }
 0xed2   : > { %4269 = vmatprep.subr.bf16.mxu1 %v4579_v1  ;;  %v4265_v44 = vpack.c.bf16 %v2855_v43, %v2854_v7  ;;  %v4288_v7 = vpack.c.bf16 %v2968_v41, %v2967_v40  ;;  %v2969_v43 = vld [vmem:[#allocation7 + $0x70] sm:$0xff]  ;;  %v2985_v40 = vld [vmem:[#allocation7 + $0xe8] sm:$0xff] }
 0xf4d   : > { %v2666_v48 = vpop.xlane.xlu0 %2665 }
 0xf4e   : > { %v2667_v49 = vmul.f32 0.0078125, %v2666_v48  ;;  %v3468_v48 = vld [vmem:[%s5226_s6 + $0x2] sm:$0x3] }
 0xf4f   : > { %v2670_v50 = vpop.xlane.xlu1 %2669 }
 0xf50   : > { %v2672_v51 = vmul.f32 %v2667_v49, %v2667_v49  ;;  %v2671_v52 = vmul.f32 0.0078125, %v2670_v50  ;;  %v2674_v55 = vsub.f32 %v5146_v57, %v2667_v49  ;;  %v2843_v57 = vld [vmem:[#allocation6 + $0x198] sm:$0xff]  ;;  %v2727_v49 = vrot.slane %v3468_v48, %v4813_v17 }
 0xf51   : > { %v4241_v2 = vpack.c.bf16 %v2843_v57, %v2842_v62  ;;  %v2731_v50 = vrot.slane %v3468_v48, %v4805_v15 }
 0xf52   : > { %v2673_v53 = vsub.f32 %v2671_v52, %v2672_v51 }
 0xf53   : > { %4242 = vmatprep.subr.bf16.mxu0 %v4241_v2 }
 0xf54   : > { %v2675_v54 = vadd.f32 1e-12, %v2673_v53  ;;  %4244 = vmatpush3.bf16.msra.mxu0 %v4243_v26 }
 0xf55   : > { %4246 = vmatprep.subr.bf16.mxu0 %v4245_v6 }
 0xf56   : > { %4418 = vrsqrt.f32 %v2675_v54 }
 0xf58   : > { %4248 = vmatpush3.bf16.msra.mxu0 %v4247_v9  ;;  %v2956_v9 = vld [vmem:[#allocation7 + $0x8] sm:$0xff] }
 0xf59   : > { %4250 = vmatprep.subr.bf16.mxu0 %v4249_v12  ;;  %v4270_v11 = vpack.c.bf16 %v2956_v9, %v2955_v42  ;;  %v2958_v12 = vld [vmem:[#allocation7 + $0x18] sm:$0xff]  ;;  %v2973_v9 = vld [vmem:[#allocation7 + $0x88] sm:$0xff] }
 0xf5a   : > { %v4273_v13 = vpack.c.bf16 %v2958_v12, %v2957_v10  ;;  %v2974_v10 = vld [vmem:[#allocation7 + $0x90] sm:$0xff]  ;;  %v2975_v12 = vld [vmem:[#allocation7 + $0x98] sm:$0xff] }
 0xf5c   : > { %4252 = vmatpush3.bf16.msra.mxu0 %v4251_v20 }
 0xf5d   : > { %4254 = vmatprep.subr.bf16.mxu0 %v4253_v23 }
 0xf60   : > { %v4419_v28 = vpop.eup %4418  ;;  %4256 = vmatpush3.bf16.msra.mxu0 %v4255_v29  ;;  %v4276_v29 = vpack.c.bf16 %v2960_v35, %v2959_v24  ;;  %v2977_v24 = vld [vmem:[#allocation7 + $0xa8] sm:$0xff] }
 0xf61   : > { %v2677_v58 = vmul.f32 %v4419_v28, %v2674_v55  ;;  %4258 = vmatprep.subr.bf16.mxu0 %v4257_v30  ;;  %v2961_v30 = vld [vmem:[#allocation7 + $0x30] sm:$0xff] }
 0xf62   : > { %v4279_v33 = vpack.c.bf16 %v2962_v32, %v2961_v30  ;;  %v2979_v30 = vld [vmem:[#allocation7 + $0xb8] sm:$0xff] }
 0xf63   : > { %v2682_v60 = vmul.f32 %v2681_v56, %v2677_v58 }
 0xf64   : > { %4260 = vmatpush3.bf16.msra.mxu0 %v4259_v39  ;;  %v2966_v39 = vld [vmem:[#allocation7 + $0x58] sm:$0xff] }
 0xf65   : > { %v5159_v61 = vadd.f32 %v2686_v59, %v2682_v60  ;;  %4262 = vmatprep.subr.bf16.mxu0 %v4261_v31 }
 0xf67   : > { %2799 = vmatmul.mubr.f32.vlgmr.msra.gmra.mrb[38].mxu1 %v5159_v61 }
 0xf68   : > { %3933 = vmatprep.mubr.msk.f32.mxu1 %vm4580_vm0, %v4578_v0  ;;  %4264 = vmatpush3.bf16.msra.mxu0 %v4263_v8  ;;  %v2970_v8 = vld [vmem:[#allocation7 + $0x78] sm:$0xff] }
 0xf69   : > { %4266 = vmatprep.subr.bf16.mxu0 %v4265_v44  ;;  %4271 = vmatpush3.bf16.msra.mxu1 %v4270_v11  ;;  %v4291_v44 = vpack.c.bf16 %v2970_v8, %v2969_v43  ;;  %v2987_v43 = vld [vmem:[#allocation7 + $0xf8] sm:$0xff] }
 0xf6a   : > { %4272 = vmatprep.subr.bf16.mxu1 %v4579_v1 }
 0xf6c   : > { %4268 = vmatpush3.bf16.msra.mxu0 %v4267_v47 }
 0xf6d   : > { %3936 = vmatprep.subr.mxu0 %v4578_v0  ;;  %4274 = vmatpush3.bf16.msra.mxu1 %v4273_v13  ;;  %v4297_v13 = vpack.c.bf16 %v2975_v12, %v2974_v10 }
 0xf6e   : > { %4275 = vmatprep.subr.bf16.mxu1 %v4579_v1 }
 0xf71   : > { %4277 = vmatpush3.bf16.msra.mxu1 %v4276_v29  ;;  %v2978_v29 = vld [vmem:[#allocation7 + $0xb0] sm:$0xff] }
 0xf72   : > { %4278 = vmatprep.subr.bf16.mxu1 %v4579_v1  ;;  %v4303_v32 = vpack.c.bf16 %v2979_v30, %v2978_v29 }
 0xf75   : > { %4280 = vmatpush3.bf16.msra.mxu1 %v4279_v33  ;;  %v2980_v33 = vld [vmem:[#allocation7 + $0xc0] sm:$0xff] }
 0xf76   : > { %4281 = vmatprep.subr.bf16.mxu1 %v4579_v1 }
 0xf79   : > { %4283 = vmatpush3.bf16.msra.mxu1 %v4282_v38  ;;  %v4306_v38 = vpack.c.bf16 %v2981_v36, %v2980_v33 }
 0xf7a   : > { %4284 = vmatprep.subr.bf16.mxu1 %v4579_v1 }
0x103a   : > { %v2800_v51 = vpop.f32.mrb[38].mxu1 }
0x103b   : > { %v2801_v52 = vadd.f32 %v2800_v51, %v2727_v49  ;;  %v2802_v53 = vpop.f32.mrb[39].mxu1 }
0x103c   : > { %v2803_v54 = vadd.f32 %v2802_v53, %v2731_v50  ;;  %v2948_v53 = vrot.slane %v5017_v16, %v1686_v34 }
0x103d   : > { %v2807_v55 = vmul.f32 0.044715, %v2801_v52  ;;  %v2805_v5 = vmul.f32 0.5, %v2801_v52 }
0x103e   : > { %v2808_v56 = vmul.f32 0.044715, %v2803_v54  ;;  %v2806_v15 = vmul.f32 0.5, %v2803_v54 }
0x103f   : > { %v2809_v28 = vmul.f32 %v2807_v55, %v2801_v52 }
0x1040   : > { %v2810_v58 = vmul.f32 %v2808_v56, %v2803_v54  ;;  %v3469_v56 = vld [vmem:[%s5227_s7 + $0x18] ss:$0 sm:$0xff] }
0x1041   : > { %v2811_v59 = vmul.f32 %v2809_v28, %v2801_v52 }
0x1042   : > { %v2812_v60 = vmul.f32 %v2810_v58, %v2803_v54 }
0x1043   : > { %v2813_v62 = vadd.f32 %v2811_v59, %v2801_v52 }
0x1044   : > { %v2814_v57 = vadd.f32 %v2812_v60, %v2803_v54 }
0x1045   : > { %v2815_v2 = vmul.f32 0.7978846, %v2813_v62  ;;  %v4434_v62 = vld [vmem:[%s4854_s25] sm:$0x1] }
0x1046   : > { %v2816_v3 = vmul.f32 0.7978846, %v2814_v57  ;;  %vm3130_vm5 = vcmp.lt.f32.partialorder %v4434_v62, 0.0 }
0x1047   : > { %4420 = vtanh.f32 %v2815_v2 }
0x1048   : > { %4422 = vtanh.f32 %v2816_v3 }
0x1051   : > { %v4421_v25 = vpop.eup %4420 }
0x1052   : > { %v4423_v17 = vpop.eup %4422  ;;  %v2819_v26 = vadd.f32 1.0, %v4421_v25 }
0x1053   : > { %v2820_v4 = vadd.f32 1.0, %v4423_v17 }
0x1054   : > { %v2821_v27 = vmul.f32 %v2819_v26, %v2805_v5 }
0x1055   : > { %v2822_v6 = vmul.f32 %v2820_v4, %v2806_v15 }
0x1057   : > { %2920 = vmatprep.mubr.f32.mxu0 %v2822_v6 }
0x1058   : > { %2921 = vmatmul.mubr.f32.vlgmr.msra.gmra.mrb[10].mxu0 %v2821_v27 }
0x1059   : > { %3938 = vmatprep.mubr.msk.f32.mxu0 %vm4580_vm0, %v4578_v0 }
0x112b   : > { %v3640_v18 = vpop.f32.mrb[10].mxu0 }
0x112c   : > { %v3641_v19 = vpop.f32.mrb[11].mxu0 }
0x112d   : > { %v3642_v20 = vadd.f32 %v3641_v19, %v3640_v18 }
0x112f   : > { %v2926_v22 = vadd.f32 %v3642_v20, %v5159_v61  ;;  %v2965_v61 = vld [vmem:[#allocation7 + $0x50] sm:$0xff] }
0x1130   : > { %v4285_v31 = vpack.c.bf16 %v2966_v39, %v2965_v61  ;;  %v2983_v61 = vld [vmem:[#allocation7 + $0xd8] sm:$0xff] }
0x1131   : > { %v2931_v37 = vadd.f32 %v2930_v21, %v2926_v22  ;;  %v4309_v39 = vpack.c.bf16 %v2983_v61, %v2982_v63 }
0x1132   : > { %4286 = vmatpush3.bf16.msra.mxu1 %v4285_v31  ;;  %v2984_v31 = vld [vmem:[#allocation7 + $0xe0] sm:$0xff] }
0x1133   : > { %2932 = vadd.xlane.f32.xlu0 %v2931_v37  ;;  %v2935_v23 = vmul.f32 %v2931_v37, %v2931_v37  ;;  %4287 = vmatprep.subr.bf16.mxu1 %v4579_v1  ;;  %v4312_v41 = vpack.c.bf16 %v2985_v40, %v2984_v31 }
0x1136   : > { %4289 = vmatpush3.bf16.msra.mxu1 %v4288_v7  ;;  %v2986_v7 = vld [vmem:[#allocation7 + $0xf0] sm:$0xff] }
0x1137   : > { %2936 = vadd.xlane.f32.xlu0 %v2935_v23  ;;  %4290 = vmatprep.subr.bf16.mxu1 %v4579_v1  ;;  %v2976_v23 = vld [vmem:[#allocation7 + $0xa0] sm:$0xff]  ;;  %v4315_v8 = vpack.c.bf16 %v2987_v43, %v2986_v7 }
0x1138   : > { %v4300_v35 = vpack.c.bf16 %v2977_v24, %v2976_v23 }
0x113a   : > { %4292 = vmatpush3.bf16.msra.mxu1 %v4291_v44 }
0x113b   : > { %3941 = vmatprep.subr.mxu1 %v4578_v0 }
0x11c0   : > { %v2933_v45 = vpop.xlane.xlu0 %2932 }
0x11c1   : > { %v2934_v46 = vmul.f32 0.0078125, %v2933_v45 }
0x11c3   : > { %v2939_v48 = vmul.f32 %v2934_v46, %v2934_v46  ;;  %v2941_v52 = vsub.f32 %v2931_v37, %v2934_v46 }
0x11c4   : > { %v2937_v47 = vpop.xlane.xlu0 %2936 }
0x11c5   : > { %v2938_v49 = vmul.f32 0.0078125, %v2937_v47 }
0x11c7   : > { %v2940_v50 = vsub.f32 %v2938_v49, %v2939_v48 }
0x11c9   : > { %v2942_v51 = vadd.f32 1e-12, %v2940_v50 }
0x11cb   : > { %4424 = vrsqrt.f32 %v2942_v51  ;;  %v3235_v51 = vrot.slane %v5196_v14, 1 }
0x11d5   : > { %v4425_v54 = vpop.eup %4424 }
0x11d6   : > { %v2944_v55 = vmul.f32 %v4425_v54, %v2941_v52  ;;  %v3238_v54 = vrot.slane %v5196_v14, 2 }
0x11d8   : > { %v2949_v28 = vmul.f32 %v2948_v53, %v2944_v55 }
0x11da   : > { %v2954_v58 = vadd.f32 %v3469_v56, %v2949_v28 }
0x11dc   : > { %3934 = vmatmul.mubr.f32.vlgmr.msra.gmra.mrb[40].mxu1 %v2954_v58  ;;  %3937 = vmatpush3.xpose.msra.mxu0 %v2954_v58 }
0x11dd   : > { %3942 = vmatpush3.msra.mxu1 %v2954_v58  ;;  %3943 = vmatprep.mubr.msk.f32.mxu1 %vm4580_vm0, %v4578_v0 }
0x11de   : > { %4293 = vmatprep.subr.bf16.mxu0 %v4579_v1 }
0x12af   : > { %v3055_v34 = vpop.f32.mrb[40].mxu1 }
0x12b0   : > { %v3056_v16 = vadd.f32 %v3055_v34, %v5196_v14  ;;  %v3935_v59 = vpop.f32.mrb[41].mxu1 }
0x12b2   : > { %4426 = vtanh.f32 %v3056_v16 }
0x12bc   : > { %v4427_v60 = vpop.eup %4426 }
0x12bd   : > { %3939 = vmatmul.mubr.f32.vlgmr.msra.gmra.mrb[12].mxu0 %v4427_v60 }
0x12be   : > { %3978 = vmatprep.mubr.msk.f32.mxu0 %vm4580_vm0, %v4578_v0  ;;  %v2972_v0 = vld [vmem:[#allocation7 + $0x80] sm:$0xff] }
0x12bf   : > { %v4294_v11 = vpack.c.bf16 %v2973_v9, %v2972_v0 }
0x12c1   : > { %4295 = vmatpush3.bf16.msra.mxu0 %v4294_v11 }
0x12c2   : > { %4296 = vmatprep.subr.bf16.mxu0 %v4579_v1 }
0x12c5   : > { %4298 = vmatpush3.bf16.msra.mxu0 %v4297_v13 }
0x12c6   : > { %4299 = vmatprep.subr.bf16.mxu0 %v4579_v1 }
0x12c9   : > { %4301 = vmatpush3.bf16.msra.mxu0 %v4300_v35 }
0x12ca   : > { %4302 = vmatprep.subr.bf16.mxu0 %v4579_v1 }
0x12cd   : > { %4304 = vmatpush3.bf16.msra.mxu0 %v4303_v32 }
0x12ce   : > { %4305 = vmatprep.subr.bf16.mxu0 %v4579_v1 }
0x12d1   : > { %4307 = vmatpush3.bf16.msra.mxu0 %v4306_v38 }
0x12d2   : > { %4308 = vmatprep.subr.bf16.mxu0 %v4579_v1 }
0x12d5   : > { %4310 = vmatpush3.bf16.msra.mxu0 %v4309_v39 }
0x12d6   : > { %4311 = vmatprep.subr.bf16.mxu0 %v4579_v1 }
0x12d9   : > { %4313 = vmatpush3.bf16.msra.mxu0 %v4312_v41 }
0x12da   : > { %4314 = vmatprep.subr.bf16.mxu0 %v4579_v1  ;;  %v3241_v1 = vrot.slane %v5196_v14, 3 }
0x12dd   : > { %4316 = vmatpush3.bf16.msra.mxu0 %v4315_v8 }
0x1390   : > { %v3126_v57 = vpop.f32.mrb[12].mxu0 }
0x1391   : > { %v3131_v2 = vsel %vm3130_vm5, -1e+09, %v3126_v57  ;;  %v3940_v3 = vpop.f32.mrb[13].mxu0 }
0x1392   : > { %v3133_v25 = vsel %vm3132_vm6, %v3131_v2, -inf }
0x1393   : > { %3134 = vmax.xlane.f32.xlu1 %v3133_v25 }
0x1420   : > { %v3135_v17 = vpop.xlane.xlu1 %3134 }
0x1421   : > { %v3136_v26 = vsub.f32 %v3131_v2, %v3135_v17 }
0x1423   : > { %v3137_v15 = vmul.f32 1.442695, %v3136_v26 }
0x1425   : > { %4428 = vpow2.f32 %v3137_v15 }
0x142f   : > { %v4429_v4 = vpop.eup %4428 }
0x1430   : > { %v3139_v5 = vsel %vm3132_vm6, %v4429_v4, 0.0 }
0x1431   : > { %3140 = vadd.xlane.f32.xlu0 %v3139_v5 }
0x14be   : > { %v3141_v6 = vpop.xlane.xlu0 %3140 }
0x14bf   : > { %4430 = vrcp.f32 %v3141_v6 }
0x14c9   : > { %v4431_v27 = vpop.eup %4430 }
0x14ca   : > { %v3143_v42 = vmul.f32 %v4431_v27, %v4429_v4 }
0x14cc   : > { %3944 = vmatmul.mubr.msk.f32.vlgmr.msra.gmra.mrb[42].mxu1 %vm951_vm2, %v3143_v42 }
0x159f   : > { %v3213_v18 = vpop.f32.mrb[42].mxu1 }
0x15a0   : > { %v3217_v19 = vadd.f32 %v4427_v60, %v3213_v18  ;;  %v3945_v20 = vpop.f32.mrb[43].mxu1 }
0x15a2   : > { %v3219_v21 = vsel %vm3218_vm7, %v3217_v19, 0.0  ;;  %v3223_v22 = vmul.f32 %v3217_v19, %v3217_v19 }
0x15a3   : > { %3220 = vadd.xlane.f32.xlu1 %v3219_v21 }
0x15a4   : > { %v3224_v37 = vsel %vm3218_vm7, %v3223_v22, 0.0 }
0x15a5   : > { %3225 = vadd.xlane.f32.xlu0 %v3224_v37 }
0x1630   : > { %v3221_v44 = vpop.xlane.xlu1 %3220 }
0x1631   : > { %v3222_v45 = vmul.f32 0.0078125, %v3221_v44 }
0x1632   : > { %v3226_v46 = vpop.xlane.xlu0 %3225 }
0x1633   : > { %v3228_v47 = vmul.f32 %v3222_v45, %v3222_v45  ;;  %v3227_v48 = vmul.f32 0.0078125, %v3226_v46  ;;  %v3230_v52 = vsub.f32 %v3217_v19, %v3222_v45 }
0x1635   : > { %v3229_v49 = vsub.f32 %v3227_v48, %v3228_v47 }
0x1637   : > { %v3231_v50 = vadd.f32 1e-05, %v3229_v49 }
0x1639   : > { %4432 = vrsqrt.f32 %v3231_v50 }
0x1643   : > { %v4433_v53 = vpop.eup %4432 }
0x1644   : > { %v3233_v55 = vmul.f32 %v4433_v53, %v3230_v52 }
0x1646   : > { %v3237_v56 = vmul.f32 %v3235_v51, %v3233_v55 }
0x1648   : > { %v3240_v28 = vadd.f32 %v3238_v54, %v3237_v56 }
0x164a   : > { %3979 = vmatmul.mubr.f32.vlgmr.msra.gmra.mrb[14].mxu0 %v3240_v28 }
0x171d   : > { %v3309_v58 = vpop.f32.mrb[14].mxu0 }
0x171e   : > { %v3310_v34 = vadd.f32 %v3309_v58, %v3241_v1  ;;  %v3980_v16 = vpop.f32.mrb[15].mxu0 }
0x1720   : > { %3313 = vst [vmem:[%s425_s30] sm:$0x1] %v3310_v34 }
0x1721 PF: > { %s23_s13 = sadd.s32 1, %s4566_s13  }
0x1722   : > { %p20_p1 = scmp.ge.s32.totalorder %s23_s13, 4  }
0x1724   :  { %22 = sbr.rel (!%p20_p1) target bundleno = 3 (0x3), region = 117 }
0x172b   :  { %3331 = vsyncpa [#allocation3], 1 }
0x172c   :  { %3333 = vsyncpa [#allocation3 + $0x1], 1 }
0x172d   :  { %3334 = vsyncpa [#allocation5], 1 }
0x172e   :  { %3335 = vsyncpa [#allocation8], 1 }

</bundles_post_ra>
